<compile_context>
chip_gen: v7x
topology: tpu7x:2x2x1
jax: 0.10.0
libtpu: 0.0.40
codegen_flags: <defaults>
</compile_context>

<pallas_src>
import functools
import numpy as np
import jax
import jax.numpy as jnp
from jax.experimental import pallas as pl

# ----------------------------- model config (small) -----------------------------
D_MODEL = 32
NUM_HEADS = 4
DEPTH = D_MODEL // NUM_HEADS
FFN_DIM = D_MODEL
EPS = 1e-5                                            # torch.nn.LayerNorm default

# Reference quirk reproduced intentionally: scale = (depth // num_heads) ** -0.5 uses INTEGER
# division.  Guard it so a config with num_heads > depth fails loudly instead of silently.
assert DEPTH // NUM_HEADS > 0, "reference scale quirk requires depth >= num_heads"
SCALE = float(DEPTH // NUM_HEADS) ** (-0.5)


# ------------------------------ Pallas kernel bodies ------------------------------
def _proj_kernel(dec_ref, enc_ref, wq_ref, wk_ref, wv_ref, b_ref,
                 q_ref, k_ref, v_ref, kc_ref, vc_ref):
    # Fused self-attention Q/K/V projection + cross-attention K/V projection.
    # Outputs are already split per tensor, so the wrapper never has to column-slice.
    dec = dec_ref[...]
    enc = enc_ref[...]
    wq, wk, wv = wq_ref[...], wk_ref[...], wv_ref[...]
    bq = b_ref[0:1, :]
    bk = b_ref[1:2, :]
    bv = b_ref[2:3, :]
    q_ref[...] = jnp.dot(dec, wq, preferred_element_type=jnp.float32) + bq
    k_ref[...] = jnp.dot(dec, wk, preferred_element_type=jnp.float32) + bk
    v_ref[...] = jnp.dot(dec, wv, preferred_element_type=jnp.float32) + bv
    kc_ref[...] = jnp.dot(enc, wk, preferred_element_type=jnp.float32) + bk
    vc_ref[...] = jnp.dot(enc, wv, preferred_element_type=jnp.float32) + bv


def _attention_kernel(q_ref, k_ref, v_ref, ctx_ref, attn_ref, *, scale):
    # ALL heads of ALL batch elements in one gridless invocation (8 tiny batched matmuls).
    q = q_ref[...]                      # (BH, Sq, depth)
    k = k_ref[...]                      # (BH, Sk, depth)
    v = v_ref[...]                      # (BH, Sk, depth)
    s = jnp.einsum("hqd,hkd->hqk", q, k, preferred_element_type=jnp.float32) * scale
    s = s - jnp.max(s, axis=-1, keepdims=True)
    e = jnp.exp(s)
    p = e / jnp.sum(e, axis=-1, keepdims=True)        # exact divide (review feedback)
    attn_ref[...] = p                   # returned by the module, so it must hit HBM
    ctx_ref[...] = jnp.einsum("hqk,hkd->hqd", p, v, preferred_element_type=jnp.float32)


def _layernorm(y, g, b):
    mu = jnp.mean(y, axis=-1, keepdims=True)
    var = jnp.mean(jnp.square(y - mu), axis=-1, keepdims=True)
    return (y - mu) * jax.lax.rsqrt(var + EPS) * g + b


def _selfout_ln_crossq_kernel(ctx_ref, res_ref, wo_ref, wq_ref, p_ref, x1_ref, qc_ref):
    # self-attn: output linear + dropout(identity) + add&LayerNorm,
    # fused with the cross-attn query projection (shared MHA weights).
    # p_ref rows: [b_o, ln_g, ln_b, b_q]
    out = jnp.dot(ctx_ref[...], wo_ref[...], preferred_element_type=jnp.float32) + p_ref[0:1, :]
    x1 = _layernorm(res_ref[...] + out, p_ref[1:2, :], p_ref[2:3, :])
    x1_ref[...] = x1
    qc_ref[...] = jnp.dot(x1, wq_ref[...], preferred_element_type=jnp.float32) + p_ref[3:4, :]


def _crossout_ln_ffn_ln_kernel(ctx_ref, res_ref, wo_ref, w1_ref, w2_ref, p_ref, o_ref):
    # cross-attn output linear + add&LN, then FFN (Conv1d(k=1) == per-position matmul)
    # with ReLU, dropout(identity), and the final add&LN.
    # p_ref rows: [b_o, attn_ln_g, attn_ln_b, b1, b2, ffn_ln_g, ffn_ln_b]
    out = jnp.dot(ctx_ref[...], wo_ref[...], preferred_element_type=jnp.float32) + p_ref[0:1, :]
    x2 = _layernorm(res_ref[...] + out, p_ref[1:2, :], p_ref[2:3, :])
    h = jnp.maximum(
        jnp.dot(x2, w1_ref[...], preferred_element_type=jnp.float32) + p_ref[3:4, :], 0.0)
    f = jnp.dot(h, w2_ref[...], preferred_element_type=jnp.float32) + p_ref[4:5, :]
    o_ref[...] = _layernorm(x2 + f, p_ref[5:6, :], p_ref[6:7, :])


# ------------------------------ pallas_call wrappers ------------------------------
# All calls are gridless: the entire working set (<~50 KB) lives in VMEM for one invocation,
# so there is nothing to pipeline and no per-step grid overhead on any TPU generation.
def pallas_proj(dec2d, enc2d, pk):
    M, D = dec2d.shape
    Me = enc2d.shape[0]
    return pl.pallas_call(
        _proj_kernel,
        out_shape=(jax.ShapeDtypeStruct((M, D), jnp.float32),    # q (self)
                   jax.ShapeDtypeStruct((M, D), jnp.float32),    # k (self)
                   jax.ShapeDtypeStruct((M, D), jnp.float32),    # v (self)
                   jax.ShapeDtypeStruct((Me, D), jnp.float32),   # k (cross)
                   jax.ShapeDtypeStruct((Me, D), jnp.float32)),  # v (cross)
    )(dec2d, enc2d, pk["w_q"], pk["w_k"], pk["w_v"], pk["b_qkv"])


def pallas_attention(q, k, v):
    BH, Sq, dep = q.shape
    Sk = k.shape[1]
    return pl.pallas_call(
        functools.partial(_attention_kernel, scale=SCALE),
        out_shape=(jax.ShapeDtypeStruct((BH, Sq, dep), jnp.float32),
                   jax.ShapeDtypeStruct((BH, Sq, Sk), jnp.float32)),
    )(q, k, v)


def pallas_selfout_ln_crossq(ctx2d, res2d, pk):
    M, D = ctx2d.shape
    return pl.pallas_call(
        _selfout_ln_crossq_kernel,
        out_shape=(jax.ShapeDtypeStruct((M, D), jnp.float32),
                   jax.ShapeDtypeStruct((M, D), jnp.float32)),
    )(ctx2d, res2d, pk["w_o"], pk["w_q"], pk["p_self"])


def pallas_crossout_ln_ffn_ln(ctx2d, res2d, pk):
    M, D = ctx2d.shape
    return pl.pallas_call(
        _crossout_ln_ffn_ln_kernel,
        out_shape=jax.ShapeDtypeStruct((M, D), jnp.float32),
    )(ctx2d, res2d, pk["w_o"], pk["w1"], pk["w2"], pk["p_ffn"])


# ----------------------------------- forward ------------------------------------
@jax.jit
def decoder_layer_forward(pk, dec_inputs, enc_inputs):
    B, S, D = dec_inputs.shape
    Se = enc_inputs.shape[1]
    BH = B * NUM_HEADS

    dec2d = dec_inputs.reshape(B * S, D)
    enc2d = enc_inputs.reshape(B * Se, D)

    # K1: fused projections, outputs already split per tensor
    q2d, k2d, v2d, kc2d, vc2d = pallas_proj(dec2d, enc2d, pk)

    # reference quirk: plain row-major .view(B*H, -1, depth) head split.
    # These are CONTIGUOUS reshapes of contiguous arrays -> metadata only under jit.
    q = q2d.reshape(BH, S, DEPTH)
    k = k2d.reshape(BH, S, DEPTH)
    v = v2d.reshape(BH, S, DEPTH)

    # K2: self-attention (gridless, all heads at once)
    ctx, self_attn = pallas_attention(q, k, v)
    ctx2d = ctx.reshape(B * S, D)                     # .view(B, -1, depth*num_heads)

    # K3: self out-proj + add&LN + cross-attn Q projection
    x1_2d, qc2d = pallas_selfout_ln_crossq(ctx2d, dec2d, pk)

    kc = kc2d.reshape(BH, Se, DEPTH)
    vc = vc2d.reshape(BH, Se, DEPTH)
    qc = qc2d.reshape(BH, S, DEPTH)

    # K4: cross-attention (same shared-weight MultiHeadAttention module)
    ctx2, context_attn = pallas_attention(qc, kc, vc)
    ctx2_2d = ctx2.reshape(B * S, D)

    # K5: cross out-proj + add&LN + FFN + add&LN
    dec_out2d = pallas_crossout_ln_ffn_ln(ctx2_2d, x1_2d, pk)
    return dec_out2d.reshape(B, S, D), self_attn, context_attn


# ------------------------- pure-JAX reference (same math) -------------------------
def _mha_ref(p, key, value, query):
    residual = query
    B = query.shape[0]
    k = key @ p["w_k"] + p["b_k"]
    q = query @ p["w_q"] + p["b_q"]
    v = value @ p["w_v"] + p["b_v"]
    k = k.reshape(B * NUM_HEADS, -1, DEPTH)
    v = v.reshape(B * NUM_HEADS, -1, DEPTH)
    q = q.reshape(B * NUM_HEADS, -1, DEPTH)
    s = jnp.einsum("bqd,bkd->bqk", q, k) * SCALE
    a = jax.nn.softmax(s, axis=-1)
    ctx = jnp.einsum("bqk,bkd->bqd", a, v).reshape(B, -1, DEPTH * NUM_HEADS)
    out = ctx @ p["w_o"] + p["b_o"]
    y = residual + out
    mu = jnp.mean(y, axis=-1, keepdims=True)
    var = jnp.mean(jnp.square(y - mu), axis=-1, keepdims=True)
    return (y - mu) * jax.lax.rsqrt(var + EPS) * p["ln_g"] + p["ln_b"], a


def decoder_layer_reference(params, dec, enc):
    a, f = params["attn"], params["ffn"]
    x, self_a = _mha_ref(a, dec, dec, dec)
    x, ctx_a = _mha_ref(a, enc, enc, x)
    h = jnp.maximum(x @ f["w1"] + f["b1"], 0.0)
    y = h @ f["w2"] + f["b2"]
    z = x + y
    mu = jnp.mean(z, axis=-1, keepdims=True)
    var = jnp.mean(jnp.square(z - mu), axis=-1, keepdims=True)
    out = (z - mu) * jax.lax.rsqrt(var + EPS) * f["ln_g"] + f["ln_b"]
    return out, self_a, ctx_a


# ------------------------------- deterministic init ------------------------------
def init_linear(key, fan_in, fan_out):
    k1, k2 = jax.random.split(key)
    bound = 1.0 / np.sqrt(fan_in)
    w = jax.random.uniform(k1, (fan_in, fan_out), jnp.float32, -bound, bound)
    b = jax.random.uniform(k2, (fan_out,), jnp.float32, -bound, bound)
    return w, b


def init_decoder_layer(key):
    ks = jax.random.split(key, 6)
    w_q, b_q = init_linear(ks[0], D_MODEL, D_MODEL)
    w_k, b_k = init_linear(ks[1], D_MODEL, D_MODEL)
    w_v, b_v = init_linear(ks[2], D_MODEL, D_MODEL)
    w_o, b_o = init_linear(ks[3], D_MODEL, D_MODEL)
    w1, b1 = init_linear(ks[4], D_MODEL, FFN_DIM)
    w2, b2 = init_linear(ks[5], D_MODEL, FFN_DIM)   # reference: Conv1d(d_model, ffn_dim) for BOTH
    attn = dict(w_q=w_q, b_q=b_q, w_k=w_k, b_k=b_k, w_v=w_v, b_v=b_v, w_o=w_o, b_o=b_o,
                ln_g=jnp.ones((D_MODEL,), jnp.float32), ln_b=jnp.zeros((D_MODEL,), jnp.float32))
    ffn = dict(w1=w1, b1=b1, w2=w2, b2=b2,
               ln_g=jnp.ones((D_MODEL,), jnp.float32), ln_b=jnp.zeros((D_MODEL,), jnp.float32))
    return dict(attn=attn, ffn=ffn)


def pack_params(params):
    # Pack the tiny per-kernel vectors into single (k, D) operands to minimize the number of
    # separate DMA streams per pallas_call; the big (D, D) weight tiles stay un-duplicated.
    a, f = params["attn"], params["ffn"]
    return dict(
        w_q=a["w_q"], w_k=a["w_k"], w_v=a["w_v"],
        b_qkv=jnp.stack([a["b_q"], a["b_k"], a["b_v"]], axis=0),            # (3, D)
        w_o=a["w_o"],
        p_self=jnp.stack([a["b_o"], a["ln_g"], a["ln_b"], a["b_q"]], axis=0),  # (4, D)
        w1=f["w1"], w2=f["w2"],
        p_ffn=jnp.stack([a["b_o"], a["ln_g"], a["ln_b"],
                         f["b1"], f["b2"], f["ln_g"], f["ln_b"]], axis=0),   # (7, D)
    )


# --------------------------------------- main ------------------------------------
if __name__ == "__main__":
    B, S_DEC, S_ENC = 2, 8, 8

    root = jax.random.PRNGKey(0)
    k_params, k_dec, k_enc = jax.random.split(root, 3)
    params = init_decoder_layer(k_params)
    packed = pack_params(params)

    dec_inputs = jax.random.normal(k_dec, (B, S_DEC, D_MODEL), jnp.float32)
    enc_inputs = jax.random.normal(k_enc, (B, S_ENC, D_MODEL), jnp.float32)

    out, self_attn, ctx_attn = decoder_layer_forward(packed, dec_inputs, enc_inputs)
    out = jax.block_until_ready(out)
    self_attn = jax.block_until_ready(self_attn)
    ctx_attn = jax.block_until_ready(ctx_attn)

    # Run the XLA reference with full-f32 matmuls so the comparison is against exact math.
    with jax.default_matmul_precision("highest"):
        ref_out, ref_sa, ref_ca = decoder_layer_reference(params, dec_inputs, enc_inputs)
        ref_out = jax.block_until_ready(ref_out)

    assert out.shape == (B, S_DEC, D_MODEL)
    assert self_attn.shape == (B * NUM_HEADS, S_DEC, S_DEC)
    assert ctx_attn.shape == (B * NUM_HEADS, S_DEC, S_ENC)
    # 100x tighter than before (exact softmax divide); remaining slack only covers MXU f32
    # pass-decomposition differences between Mosaic's default and the "highest" XLA reference.
    TOL = dict(atol=5e-4, rtol=5e-4)
    assert np.allclose(np.asarray(out), np.asarray(ref_out), **TOL)
    assert np.allclose(np.asarray(self_attn), np.asarray(ref_sa), **TOL)
    assert np.allclose(np.asarray(ctx_attn), np.asarray(ref_ca), **TOL)
    assert np.allclose(np.asarray(self_attn).sum(-1), 1.0, atol=1e-5)
    assert np.allclose(np.asarray(ctx_attn).sum(-1), 1.0, atol=1e-5)
    print("KERNEL_OK")
</pallas_src>

<mosaic_0001>
module attributes {stable_mosaic.version = 11 : i64} {
  func.func @_proj_kernel(%arg0: memref<16x32xf32, #tpu.memory_space<vmem>>, %arg1: memref<16x32xf32, #tpu.memory_space<vmem>>, %arg2: memref<32x32xf32, #tpu.memory_space<vmem>>, %arg3: memref<32x32xf32, #tpu.memory_space<vmem>>, %arg4: memref<32x32xf32, #tpu.memory_space<vmem>>, %arg5: memref<3x32xf32, #tpu.memory_space<vmem>>, %arg6: memref<16x32xf32, #tpu.memory_space<vmem>>, %arg7: memref<16x32xf32, #tpu.memory_space<vmem>>, %arg8: memref<16x32xf32, #tpu.memory_space<vmem>>, %arg9: memref<16x32xf32, #tpu.memory_space<vmem>>, %arg10: memref<16x32xf32, #tpu.memory_space<vmem>>) attributes {dimension_semantics = [], scalar_prefetch = 0 : i64, scratch_operands = 0 : i64, tpu.core_type = #tpu.core_type<tc>} {
    %c0 = arith.constant 0 : index
    %c0_0 = arith.constant 0 : index
    %0 = vector.load %arg0[%c0, %c0_0] : memref<16x32xf32, #tpu.memory_space<vmem>>, vector<16x32xf32>
    %c0_1 = arith.constant 0 : index
    %c0_2 = arith.constant 0 : index
    %1 = vector.load %arg1[%c0_1, %c0_2] : memref<16x32xf32, #tpu.memory_space<vmem>>, vector<16x32xf32>
    %c0_3 = arith.constant 0 : index
    %c0_4 = arith.constant 0 : index
    %2 = vector.load %arg2[%c0_3, %c0_4] : memref<32x32xf32, #tpu.memory_space<vmem>>, vector<32x32xf32>
    %c0_5 = arith.constant 0 : index
    %c0_6 = arith.constant 0 : index
    %3 = vector.load %arg3[%c0_5, %c0_6] : memref<32x32xf32, #tpu.memory_space<vmem>>, vector<32x32xf32>
    %c0_7 = arith.constant 0 : index
    %c0_8 = arith.constant 0 : index
    %4 = vector.load %arg4[%c0_7, %c0_8] : memref<32x32xf32, #tpu.memory_space<vmem>>, vector<32x32xf32>
    %c0_9 = arith.constant 0 : index
    %c0_10 = arith.constant 0 : index
    %5 = vector.load %arg5[%c0_9, %c0_10] : memref<3x32xf32, #tpu.memory_space<vmem>>, vector<1x32xf32>
    %c1 = arith.constant 1 : index
    %c0_11 = arith.constant 0 : index
    %6 = vector.load %arg5[%c1, %c0_11] : memref<3x32xf32, #tpu.memory_space<vmem>>, vector<1x32xf32>
    %c2 = arith.constant 2 : index
    %c0_12 = arith.constant 0 : index
    %7 = vector.load %arg5[%c2, %c0_12] : memref<3x32xf32, #tpu.memory_space<vmem>>, vector<1x32xf32>
    %cst = arith.constant dense<0.000000e+00> : vector<16x32xf32>
    %8 = tpu.matmul %0, %2, %cst {dimension_numbers = #tpu.dot_dimension_numbers<[1], [0], [0], [1], [0, 0, 1, 1], [], []>} : vector<16x32xf32>, vector<32x32xf32>, vector<16x32xf32> -> vector<16x32xf32>
    %9 = vector.broadcast %5 : vector<1x32xf32> to vector<16x32xf32>
    %10 = arith.addf %8, %9 : vector<16x32xf32>
    %c0_13 = arith.constant 0 : index
    %c0_14 = arith.constant 0 : index
    %11 = vector.load %arg6[%c0_13, %c0_14] : memref<16x32xf32, #tpu.memory_space<vmem>>, vector<16x32xf32>
    tpu.vector_store %arg6[%c0_13, %c0_14], %10 {strides = array<i32>} : memref<16x32xf32, #tpu.memory_space<vmem>>, vector<16x32xf32>,
    %cst_15 = arith.constant dense<0.000000e+00> : vector<16x32xf32>
    %12 = tpu.matmul %0, %3, %cst_15 {dimension_numbers = #tpu.dot_dimension_numbers<[1], [0], [0], [1], [0, 0, 1, 1], [], []>} : vector<16x32xf32>, vector<32x32xf32>, vector<16x32xf32> -> vector<16x32xf32>
    %13 = vector.broadcast %6 : vector<1x32xf32> to vector<16x32xf32>
    %14 = arith.addf %12, %13 : vector<16x32xf32>
    %c0_16 = arith.constant 0 : index
    %c0_17 = arith.constant 0 : index
    %15 = vector.load %arg7[%c0_16, %c0_17] : memref<16x32xf32, #tpu.memory_space<vmem>>, vector<16x32xf32>
    tpu.vector_store %arg7[%c0_16, %c0_17], %14 {strides = array<i32>} : memref<16x32xf32, #tpu.memory_space<vmem>>, vector<16x32xf32>,
    %cst_18 = arith.constant dense<0.000000e+00> : vector<16x32xf32>
    %16 = tpu.matmul %0, %4, %cst_18 {dimension_numbers = #tpu.dot_dimension_numbers<[1], [0], [0], [1], [0, 0, 1, 1], [], []>} : vector<16x32xf32>, vector<32x32xf32>, vector<16x32xf32> -> vector<16x32xf32>
    %17 = vector.broadcast %7 : vector<1x32xf32> to vector<16x32xf32>
    %18 = arith.addf %16, %17 : vector<16x32xf32>
    %c0_19 = arith.constant 0 : index
    %c0_20 = arith.constant 0 : index
    %19 = vector.load %arg8[%c0_19, %c0_20] : memref<16x32xf32, #tpu.memory_space<vmem>>, vector<16x32xf32>
    tpu.vector_store %arg8[%c0_19, %c0_20], %18 {strides = array<i32>} : memref<16x32xf32, #tpu.memory_space<vmem>>, vector<16x32xf32>,
    %cst_21 = arith.constant dense<0.000000e+00> : vector<16x32xf32>
    %20 = tpu.matmul %1, %3, %cst_21 {dimension_numbers = #tpu.dot_dimension_numbers<[1], [0], [0], [1], [0, 0, 1, 1], [], []>} : vector<16x32xf32>, vector<32x32xf32>, vector<16x32xf32> -> vector<16x32xf32>
    %21 = vector.broadcast %6 : vector<1x32xf32> to vector<16x32xf32>
    %22 = arith.addf %20, %21 : vector<16x32xf32>
    %c0_22 = arith.constant 0 : index
    %c0_23 = arith.constant 0 : index
    %23 = vector.load %arg9[%c0_22, %c0_23] : memref<16x32xf32, #tpu.memory_space<vmem>>, vector<16x32xf32>
    tpu.vector_store %arg9[%c0_22, %c0_23], %22 {strides = array<i32>} : memref<16x32xf32, #tpu.memory_space<vmem>>, vector<16x32xf32>,
    %cst_24 = arith.constant dense<0.000000e+00> : vector<16x32xf32>
    %24 = tpu.matmul %1, %4, %cst_24 {dimension_numbers = #tpu.dot_dimension_numbers<[1], [0], [0], [1], [0, 0, 1, 1], [], []>} : vector<16x32xf32>, vector<32x32xf32>, vector<16x32xf32> -> vector<16x32xf32>
    %25 = vector.broadcast %7 : vector<1x32xf32> to vector<16x32xf32>
    %26 = arith.addf %24, %25 : vector<16x32xf32>
    %c0_25 = arith.constant 0 : index
    %c0_26 = arith.constant 0 : index
    %27 = vector.load %arg10[%c0_25, %c0_26] : memref<16x32xf32, #tpu.memory_space<vmem>>, vector<16x32xf32>
    tpu.vector_store %arg10[%c0_25, %c0_26], %26 {strides = array<i32>} : memref<16x32xf32, #tpu.memory_space<vmem>>, vector<16x32xf32>,
    return
  }
}

module attributes {stable_mosaic.version = 11 : i64} {
  func.func @_attention_kernel(%arg0: memref<8x8x8xf32, #tpu.memory_space<vmem>>, %arg1: memref<8x8x8xf32, #tpu.memory_space<vmem>>, %arg2: memref<8x8x8xf32, #tpu.memory_space<vmem>>, %arg3: memref<8x8x8xf32, #tpu.memory_space<vmem>>, %arg4: memref<8x8x8xf32, #tpu.memory_space<vmem>>) attributes {dimension_semantics = [], scalar_prefetch = 0 : i64, scratch_operands = 0 : i64, tpu.core_type = #tpu.core_type<tc>} {
    %c0 = arith.constant 0 : index
    %c0_0 = arith.constant 0 : index
    %c0_1 = arith.constant 0 : index
    %0 = vector.load %arg0[%c0, %c0_0, %c0_1] : memref<8x8x8xf32, #tpu.memory_space<vmem>>, vector<8x8x8xf32>
    %c0_2 = arith.constant 0 : index
    %c0_3 = arith.constant 0 : index
    %c0_4 = arith.constant 0 : index
    %1 = vector.load %arg1[%c0_2, %c0_3, %c0_4] : memref<8x8x8xf32, #tpu.memory_space<vmem>>, vector<8x8x8xf32>
    %c0_5 = arith.constant 0 : index
    %c0_6 = arith.constant 0 : index
    %c0_7 = arith.constant 0 : index
    %2 = vector.load %arg2[%c0_5, %c0_6, %c0_7] : memref<8x8x8xf32, #tpu.memory_space<vmem>>, vector<8x8x8xf32>
    "tpu.trace_start"() <{level = 10 : i32, message = "hqd,hkd->hqk"}> : () -> ()
    %cst = arith.constant dense<0.000000e+00> : vector<8x8x8xf32>
    %3 = tpu.matmul %0, %1, %cst {dimension_numbers = #tpu.dot_dimension_numbers<[2], [2], [1], [1], [0, 0, 0, 1, 1, 1], [0], [0]>} : vector<8x8x8xf32>, vector<8x8x8xf32>, vector<8x8x8xf32> -> vector<8x8x8xf32>
    "tpu.trace_stop"() : () -> ()
    %cst_8 = arith.constant 0.707106769 : f32
    %4 = vector.broadcast %cst_8 : f32 to vector<8x8x8xf32>
    %5 = arith.mulf %3, %4 : vector<8x8x8xf32>
    %cst_9 = arith.constant dense<0xFF800000> : vector<8x8xf32>
    %6 = vector.multi_reduction <maximumf>, %5, %cst_9 [2] : vector<8x8x8xf32> to vector<8x8xf32>
    %7 = vector.shape_cast %6 : vector<8x8xf32> to vector<8x8x1xf32>
    %8 = vector.broadcast %7 : vector<8x8x1xf32> to vector<8x8x8xf32>
    %9 = arith.subf %5, %8 : vector<8x8x8xf32>
    %10 = math.exp %9 : vector<8x8x8xf32>
    %cst_10 = arith.constant dense<0.000000e+00> : vector<8x8xf32>
    %11 = vector.multi_reduction <add>, %10, %cst_10 [2] : vector<8x8x8xf32> to vector<8x8xf32>
    %12 = vector.shape_cast %11 : vector<8x8xf32> to vector<8x8x1xf32>
    %13 = vector.broadcast %12 : vector<8x8x1xf32> to vector<8x8x8xf32>
    %14 = arith.divf %10, %13 : vector<8x8x8xf32>
    %c0_11 = arith.constant 0 : index
    %c0_12 = arith.constant 0 : index
    %c0_13 = arith.constant 0 : index
    %15 = vector.load %arg4[%c0_11, %c0_12, %c0_13] : memref<8x8x8xf32, #tpu.memory_space<vmem>>, vector<8x8x8xf32>
    tpu.vector_store %arg4[%c0_11, %c0_12, %c0_13], %14 {strides = array<i32>} : memref<8x8x8xf32, #tpu.memory_space<vmem>>, vector<8x8x8xf32>,
    "tpu.trace_start"() <{level = 10 : i32, message = "hqk,hkd->hqd"}> : () -> ()
    %cst_14 = arith.constant dense<0.000000e+00> : vector<8x8x8xf32>
    %16 = tpu.matmul %14, %2, %cst_14 {dimension_numbers = #tpu.dot_dimension_numbers<[2], [1], [1], [2], [0, 0, 0, 1, 1, 2], [0], [0]>} : vector<8x8x8xf32>, vector<8x8x8xf32>, vector<8x8x8xf32> -> vector<8x8x8xf32>
    "tpu.trace_stop"() : () -> ()
    %c0_15 = arith.constant 0 : index
    %c0_16 = arith.constant 0 : index
    %c0_17 = arith.constant 0 : index
    %17 = vector.load %arg3[%c0_15, %c0_16, %c0_17] : memref<8x8x8xf32, #tpu.memory_space<vmem>>, vector<8x8x8xf32>
    tpu.vector_store %arg3[%c0_15, %c0_16, %c0_17], %16 {strides = array<i32>} : memref<8x8x8xf32, #tpu.memory_space<vmem>>, vector<8x8x8xf32>,
    return
  }
}

module attributes {stable_mosaic.version = 11 : i64} {
  func.func @_selfout_ln_crossq_kernel(%arg0: memref<16x32xf32, #tpu.memory_space<vmem>>, %arg1: memref<16x32xf32, #tpu.memory_space<vmem>>, %arg2: memref<32x32xf32, #tpu.memory_space<vmem>>, %arg3: memref<32x32xf32, #tpu.memory_space<vmem>>, %arg4: memref<4x32xf32, #tpu.memory_space<vmem>>, %arg5: memref<16x32xf32, #tpu.memory_space<vmem>>, %arg6: memref<16x32xf32, #tpu.memory_space<vmem>>) attributes {dimension_semantics = [], scalar_prefetch = 0 : i64, scratch_operands = 0 : i64, tpu.core_type = #tpu.core_type<tc>} {
    %c0 = arith.constant 0 : index
    %c0_0 = arith.constant 0 : index
    %0 = vector.load %arg0[%c0, %c0_0] : memref<16x32xf32, #tpu.memory_space<vmem>>, vector<16x32xf32>
    %c0_1 = arith.constant 0 : index
    %c0_2 = arith.constant 0 : index
    %1 = vector.load %arg2[%c0_1, %c0_2] : memref<32x32xf32, #tpu.memory_space<vmem>>, vector<32x32xf32>
    %cst = arith.constant dense<0.000000e+00> : vector<16x32xf32>
    %2 = tpu.matmul %0, %1, %cst {dimension_numbers = #tpu.dot_dimension_numbers<[1], [0], [0], [1], [0, 0, 1, 1], [], []>} : vector<16x32xf32>, vector<32x32xf32>, vector<16x32xf32> -> vector<16x32xf32>
    %c0_3 = arith.constant 0 : index
    %c0_4 = arith.constant 0 : index
    %3 = vector.load %arg4[%c0_3, %c0_4] : memref<4x32xf32, #tpu.memory_space<vmem>>, vector<1x32xf32>
    %4 = vector.broadcast %3 : vector<1x32xf32> to vector<16x32xf32>
    %5 = arith.addf %2, %4 : vector<16x32xf32>
    %c0_5 = arith.constant 0 : index
    %c0_6 = arith.constant 0 : index
    %6 = vector.load %arg1[%c0_5, %c0_6] : memref<16x32xf32, #tpu.memory_space<vmem>>, vector<16x32xf32>
    %7 = arith.addf %6, %5 : vector<16x32xf32>
    %c1 = arith.constant 1 : index
    %c0_7 = arith.constant 0 : index
    %8 = vector.load %arg4[%c1, %c0_7] : memref<4x32xf32, #tpu.memory_space<vmem>>, vector<1x32xf32>
    %c2 = arith.constant 2 : index
    %c0_8 = arith.constant 0 : index
    %9 = vector.load %arg4[%c2, %c0_8] : memref<4x32xf32, #tpu.memory_space<vmem>>, vector<1x32xf32>
    %cst_9 = arith.constant dense<0.000000e+00> : vector<16xf32>
    %10 = vector.multi_reduction <add>, %7, %cst_9 [1] : vector<16x32xf32> to vector<16xf32>
    %11 = vector.shape_cast %10 : vector<16xf32> to vector<16x1xf32>
    %cst_10 = arith.constant 3.200000e+01 : f32
    %12 = vector.broadcast %cst_10 : f32 to vector<16x1xf32>
    %13 = arith.divf %11, %12 : vector<16x1xf32>
    %14 = vector.broadcast %13 : vector<16x1xf32> to vector<16x32xf32>
    %15 = arith.subf %7, %14 : vector<16x32xf32>
    %16 = arith.mulf %15, %15 : vector<16x32xf32>
    %cst_11 = arith.constant dense<0.000000e+00> : vector<16xf32>
    %17 = vector.multi_reduction <add>, %16, %cst_11 [1] : vector<16x32xf32> to vector<16xf32>
    %18 = vector.shape_cast %17 : vector<16xf32> to vector<16x1xf32>
    %cst_12 = arith.constant 3.200000e+01 : f32
    %19 = vector.broadcast %cst_12 : f32 to vector<16x1xf32>
    %20 = arith.divf %18, %19 : vector<16x1xf32>
    %21 = vector.broadcast %13 : vector<16x1xf32> to vector<16x32xf32>
    %22 = arith.subf %7, %21 : vector<16x32xf32>
    %cst_13 = arith.constant 9.99999974E-6 : f32
    %23 = vector.broadcast %cst_13 : f32 to vector<16x1xf32>
    %24 = arith.addf %20, %23 : vector<16x1xf32>
    %25 = math.rsqrt %24 : vector<16x1xf32>
    %26 = vector.broadcast %25 : vector<16x1xf32> to vector<16x32xf32>
    %27 = arith.mulf %22, %26 : vector<16x32xf32>
    %28 = vector.broadcast %8 : vector<1x32xf32> to vector<16x32xf32>
    %29 = arith.mulf %27, %28 : vector<16x32xf32>
    %30 = vector.broadcast %9 : vector<1x32xf32> to vector<16x32xf32>
    %31 = arith.addf %29, %30 : vector<16x32xf32>
    %c0_14 = arith.constant 0 : index
    %c0_15 = arith.constant 0 : index
    %32 = vector.load %arg5[%c0_14, %c0_15] : memref<16x32xf32, #tpu.memory_space<vmem>>, vector<16x32xf32>
    tpu.vector_store %arg5[%c0_14, %c0_15], %31 {strides = array<i32>} : memref<16x32xf32, #tpu.memory_space<vmem>>, vector<16x32xf32>,
    %c0_16 = arith.constant 0 : index
    %c0_17 = arith.constant 0 : index
    %33 = vector.load %arg3[%c0_16, %c0_17] : memref<32x32xf32, #tpu.memory_space<vmem>>, vector<32x32xf32>
    %cst_18 = arith.constant dense<0.000000e+00> : vector<16x32xf32>
    %34 = tpu.matmul %31, %33, %cst_18 {dimension_numbers = #tpu.dot_dimension_numbers<[1], [0], [0], [1], [0, 0, 1, 1], [], []>} : vector<16x32xf32>, vector<32x32xf32>, vector<16x32xf32> -> vector<16x32xf32>
    %c3 = arith.constant 3 : index
    %c0_19 = arith.constant 0 : index
    %35 = vector.load %arg4[%c3, %c0_19] : memref<4x32xf32, #tpu.memory_space<vmem>>, vector<1x32xf32>
    %36 = vector.broadcast %35 : vector<1x32xf32> to vector<16x32xf32>
    %37 = arith.addf %34, %36 : vector<16x32xf32>
    %c0_20 = arith.constant 0 : index
    %c0_21 = arith.constant 0 : index
    %38 = vector.load %arg6[%c0_20, %c0_21] : memref<16x32xf32, #tpu.memory_space<vmem>>, vector<16x32xf32>
    tpu.vector_store %arg6[%c0_20, %c0_21], %37 {strides = array<i32>} : memref<16x32xf32, #tpu.memory_space<vmem>>, vector<16x32xf32>,
    return
  }
}

module attributes {stable_mosaic.version = 11 : i64} {
  func.func @_crossout_ln_ffn_ln_kernel(%arg0: memref<16x32xf32, #tpu.memory_space<vmem>>, %arg1: memref<16x32xf32, #tpu.memory_space<vmem>>, %arg2: memref<32x32xf32, #tpu.memory_space<vmem>>, %arg3: memref<32x32xf32, #tpu.memory_space<vmem>>, %arg4: memref<32x32xf32, #tpu.memory_space<vmem>>, %arg5: memref<7x32xf32, #tpu.memory_space<vmem>>, %arg6: memref<16x32xf32, #tpu.memory_space<vmem>>) attributes {dimension_semantics = [], scalar_prefetch = 0 : i64, scratch_operands = 0 : i64, tpu.core_type = #tpu.core_type<tc>} {
    %c0 = arith.constant 0 : index
    %c0_0 = arith.constant 0 : index
    %0 = vector.load %arg0[%c0, %c0_0] : memref<16x32xf32, #tpu.memory_space<vmem>>, vector<16x32xf32>
    %c0_1 = arith.constant 0 : index
    %c0_2 = arith.constant 0 : index
    %1 = vector.load %arg2[%c0_1, %c0_2] : memref<32x32xf32, #tpu.memory_space<vmem>>, vector<32x32xf32>
    %cst = arith.constant dense<0.000000e+00> : vector<16x32xf32>
    %2 = tpu.matmul %0, %1, %cst {dimension_numbers = #tpu.dot_dimension_numbers<[1], [0], [0], [1], [0, 0, 1, 1], [], []>} : vector<16x32xf32>, vector<32x32xf32>, vector<16x32xf32> -> vector<16x32xf32>
    %c0_3 = arith.constant 0 : index
    %c0_4 = arith.constant 0 : index
    %3 = vector.load %arg5[%c0_3, %c0_4] : memref<7x32xf32, #tpu.memory_space<vmem>>, vector<1x32xf32>
    %4 = vector.broadcast %3 : vector<1x32xf32> to vector<16x32xf32>
    %5 = arith.addf %2, %4 : vector<16x32xf32>
    %c0_5 = arith.constant 0 : index
    %c0_6 = arith.constant 0 : index
    %6 = vector.load %arg1[%c0_5, %c0_6] : memref<16x32xf32, #tpu.memory_space<vmem>>, vector<16x32xf32>
    %7 = arith.addf %6, %5 : vector<16x32xf32>
    %c1 = arith.constant 1 : index
    %c0_7 = arith.constant 0 : index
    %8 = vector.load %arg5[%c1, %c0_7] : memref<7x32xf32, #tpu.memory_space<vmem>>, vector<1x32xf32>
    %c2 = arith.constant 2 : index
    %c0_8 = arith.constant 0 : index
    %9 = vector.load %arg5[%c2, %c0_8] : memref<7x32xf32, #tpu.memory_space<vmem>>, vector<1x32xf32>
    %cst_9 = arith.constant dense<0.000000e+00> : vector<16xf32>
    %10 = vector.multi_reduction <add>, %7, %cst_9 [1] : vector<16x32xf32> to vector<16xf32>
    %11 = vector.shape_cast %10 : vector<16xf32> to vector<16x1xf32>
    %cst_10 = arith.constant 3.200000e+01 : f32
    %12 = vector.broadcast %cst_10 : f32 to vector<16x1xf32>
    %13 = arith.divf %11, %12 : vector<16x1xf32>
    %14 = vector.broadcast %13 : vector<16x1xf32> to vector<16x32xf32>
    %15 = arith.subf %7, %14 : vector<16x32xf32>
    %16 = arith.mulf %15, %15 : vector<16x32xf32>
    %cst_11 = arith.constant dense<0.000000e+00> : vector<16xf32>
    %17 = vector.multi_reduction <add>, %16, %cst_11 [1] : vector<16x32xf32> to vector<16xf32>
    %18 = vector.shape_cast %17 : vector<16xf32> to vector<16x1xf32>
    %cst_12 = arith.constant 3.200000e+01 : f32
    %19 = vector.broadcast %cst_12 : f32 to vector<16x1xf32>
    %20 = arith.divf %18, %19 : vector<16x1xf32>
    %21 = vector.broadcast %13 : vector<16x1xf32> to vector<16x32xf32>
    %22 = arith.subf %7, %21 : vector<16x32xf32>
    %cst_13 = arith.constant 9.99999974E-6 : f32
    %23 = vector.broadcast %cst_13 : f32 to vector<16x1xf32>
    %24 = arith.addf %20, %23 : vector<16x1xf32>
    %25 = math.rsqrt %24 : vector<16x1xf32>
    %26 = vector.broadcast %25 : vector<16x1xf32> to vector<16x32xf32>
    %27 = arith.mulf %22, %26 : vector<16x32xf32>
    %28 = vector.broadcast %8 : vector<1x32xf32> to vector<16x32xf32>
    %29 = arith.mulf %27, %28 : vector<16x32xf32>
    %30 = vector.broadcast %9 : vector<1x32xf32> to vector<16x32xf32>
    %31 = arith.addf %29, %30 : vector<16x32xf32>
    %c0_14 = arith.constant 0 : index
    %c0_15 = arith.constant 0 : index
    %32 = vector.load %arg3[%c0_14, %c0_15] : memref<32x32xf32, #tpu.memory_space<vmem>>, vector<32x32xf32>
    %cst_16 = arith.constant dense<0.000000e+00> : vector<16x32xf32>
    %33 = tpu.matmul %31, %32, %cst_16 {dimension_numbers = #tpu.dot_dimension_numbers<[1], [0], [0], [1], [0, 0, 1, 1], [], []>} : vector<16x32xf32>, vector<32x32xf32>, vector<16x32xf32> -> vector<16x32xf32>
    %c3 = arith.constant 3 : index
    %c0_17 = arith.constant 0 : index
    %34 = vector.load %arg5[%c3, %c0_17] : memref<7x32xf32, #tpu.memory_space<vmem>>, vector<1x32xf32>
    %35 = vector.broadcast %34 : vector<1x32xf32> to vector<16x32xf32>
    %36 = arith.addf %33, %35 : vector<16x32xf32>
    %cst_18 = arith.constant 0.000000e+00 : f32
    %37 = vector.broadcast %cst_18 : f32 to vector<16x32xf32>
    %38 = arith.maximumf %36, %37 : vector<16x32xf32>
    %c0_19 = arith.constant 0 : index
    %c0_20 = arith.constant 0 : index
    %39 = vector.load %arg4[%c0_19, %c0_20] : memref<32x32xf32, #tpu.memory_space<vmem>>, vector<32x32xf32>
    %cst_21 = arith.constant dense<0.000000e+00> : vector<16x32xf32>
    %40 = tpu.matmul %38, %39, %cst_21 {dimension_numbers = #tpu.dot_dimension_numbers<[1], [0], [0], [1], [0, 0, 1, 1], [], []>} : vector<16x32xf32>, vector<32x32xf32>, vector<16x32xf32> -> vector<16x32xf32>
    %c4 = arith.constant 4 : index
    %c0_22 = arith.constant 0 : index
    %41 = vector.load %arg5[%c4, %c0_22] : memref<7x32xf32, #tpu.memory_space<vmem>>, vector<1x32xf32>
    %42 = vector.broadcast %41 : vector<1x32xf32> to vector<16x32xf32>
    %43 = arith.addf %40, %42 : vector<16x32xf32>
    %44 = arith.addf %31, %43 : vector<16x32xf32>
    %c5 = arith.constant 5 : index
    %c0_23 = arith.constant 0 : index
    %45 = vector.load %arg5[%c5, %c0_23] : memref<7x32xf32, #tpu.memory_space<vmem>>, vector<1x32xf32>
    %c6 = arith.constant 6 : index
    %c0_24 = arith.constant 0 : index
    %46 = vector.load %arg5[%c6, %c0_24] : memref<7x32xf32, #tpu.memory_space<vmem>>, vector<1x32xf32>
    %cst_25 = arith.constant dense<0.000000e+00> : vector<16xf32>
    %47 = vector.multi_reduction <add>, %44, %cst_25 [1] : vector<16x32xf32> to vector<16xf32>
    %48 = vector.shape_cast %47 : vector<16xf32> to vector<16x1xf32>
    %cst_26 = arith.constant 3.200000e+01 : f32
    %49 = vector.broadcast %cst_26 : f32 to vector<16x1xf32>
    %50 = arith.divf %48, %49 : vector<16x1xf32>
    %51 = vector.broadcast %50 : vector<16x1xf32> to vector<16x32xf32>
    %52 = arith.subf %44, %51 : vector<16x32xf32>
    %53 = arith.mulf %52, %52 : vector<16x32xf32>
    %cst_27 = arith.constant dense<0.000000e+00> : vector<16xf32>
    %54 = vector.multi_reduction <add>, %53, %cst_27 [1] : vector<16x32xf32> to vector<16xf32>
    %55 = vector.shape_cast %54 : vector<16xf32> to vector<16x1xf32>
    %cst_28 = arith.constant 3.200000e+01 : f32
    %56 = vector.broadcast %cst_28 : f32 to vector<16x1xf32>
    %57 = arith.divf %55, %56 : vector<16x1xf32>
    %58 = vector.broadcast %50 : vector<16x1xf32> to vector<16x32xf32>
    %59 = arith.subf %44, %58 : vector<16x32xf32>
    %cst_29 = arith.constant 9.99999974E-6 : f32
    %60 = vector.broadcast %cst_29 : f32 to vector<16x1xf32>
    %61 = arith.addf %57, %60 : vector<16x1xf32>
    %62 = math.rsqrt %61 : vector<16x1xf32>
    %63 = vector.broadcast %62 : vector<16x1xf32> to vector<16x32xf32>
    %64 = arith.mulf %59, %63 : vector<16x32xf32>
    %65 = vector.broadcast %45 : vector<1x32xf32> to vector<16x32xf32>
    %66 = arith.mulf %64, %65 : vector<16x32xf32>
    %67 = vector.broadcast %46 : vector<1x32xf32> to vector<16x32xf32>
    %68 = arith.addf %66, %67 : vector<16x32xf32>
    %c0_30 = arith.constant 0 : index
    %c0_31 = arith.constant 0 : index
    %69 = vector.load %arg6[%c0_30, %c0_31] : memref<16x32xf32, #tpu.memory_space<vmem>>, vector<16x32xf32>
    tpu.vector_store %arg6[%c0_30, %c0_31], %68 {strides = array<i32>} : memref<16x32xf32, #tpu.memory_space<vmem>>, vector<16x32xf32>,
    return
  }
}

</mosaic_0001>

<bundles_post_ra>
// kernel: decoder_layer_forward.5
= control target key start
LH: loop header
LB: loop body
LE: loop exit
PB: predicated region body
PF: predicated region fallthrough
CT: control target
= control target key end

     0   :  { %16 = vsyncpa [#allocation3], 0  ;;  %s979_s0 = inlined_call_operand.hbm [shape: f32[16,32], index: 0, kind: input, shape index: {}]   ;;  %s980_s1 = inlined_call_operand.hbm [shape: f32[16,32], index: 1, kind: input, shape index: {}]   ;;  %s981_s2 = inlined_call_operand.vmem [shape: f32[32,32], index: 2, kind: input, shape index: {}]   ;;  %s982_s3 = inlined_call_operand.hbm [shape: f32[32,32], index: 3, kind: input, shape index: {}]   ;;  %s983_s4 = inlined_call_operand.hbm [shape: f32[32,32], index: 4, kind: input, shape index: {}]   ;;  %s984_s5 = inlined_call_operand.vmem [shape: f32[3,32], index: 5, kind: input, shape index: {}]   ;;  %s985_s6 = inlined_call_operand.vmem [shape: f32[16,32], index: 6, kind: output, shape index: {0}]   ;;  %s986_s7 = inlined_call_operand.vmem [shape: f32[16,32], index: 7, kind: output, shape index: {1}]   ;;  %s987_s8 = inlined_call_operand.vmem [shape: f32[16,32], index: 8, kind: output, shape index: {2}]   ;;  %s988_s9 = inlined_call_operand.vmem [shape: f32[16,32], index: 9, kind: output, shape index: {3}]   ;;  %s989_s10 = inlined_call_operand.vmem [shape: f32[16,32], index: 10, kind: output, shape index: {4}]  }
   0x1   :  { %17 = vsyncpa [#allocation5], 0 }
   0x2   :  { %18 = vsyncpa [#allocation8], 0  ;;  %s773_s13 = smov [#allocation4]   ;;  %s774_s15 = smov [#allocation2]  }
   0x3   :  { %s36_s14 = sshll.u32 %s773_s13, 4  ;;  %s24_s16 = sshll.u32 %s774_s15, 4  ;;  %s37_s14 = int_to_ptr.vmem [resolvable:$true] %s36_s14  ;;  %s834_s16 = int_to_ptr.vmem [resolvable:$true] %s24_s16 }
   0x4   :  { %s679_s19 = scalar_lea.hbm %s980_s1, 256 }
   0x5   :  { %p680_p0 = scmp.ne.s32.totalorder %s980_s1, %s679_s19  ;;  %p683_p1 = scmp.lt.u32.totalorder %s679_s19, %s980_s1 }
   0x7   :  { %p685_p2 = pnand %p683_p1, %p680_p0 }
   0x9   :  { %688 = shalt.err (!%p685_p2)
}
   0xa   :  { %s689_s24 = scalar_lea.vmem %s37_s14, 256  ;;  %p694_p4 = scmp.lt.s32.totalorder %s37_s14, %s37_s14 }
   0xb   :  { %p690_p3 = scmp.ne.s32.totalorder %s37_s14, %s689_s24  ;;  %p695_p5 = scmp.lt.s32.totalorder %s689_s24, %s689_s24 }
   0xd   :  { %p696_p6 = por %p695_p5, %p694_p4 }
   0xf   :  { %p697_p7 = pnand %p696_p6, %p690_p3 }
  0x11   :  { %700 = shalt.err (!%p697_p7)
}
  0x12   :  { %s775_s25 = smov 128   ;;  %s776_s26 = smov 8  }
  0x13   :  { %42 = dma.hbm_to_vmem [thread:$0]  %s980_s1, 256, %s37_s14, [#allocation5], %s775_s25, %s775_s25, %s776_s26  }
  0x14   :  { %s701_s11 = scalar_lea.hbm %s979_s0, 256 }
  0x15   :  { %p702_p8 = scmp.ne.s32.totalorder %s979_s0, %s701_s11  ;;  %p705_p9 = scmp.lt.u32.totalorder %s701_s11, %s979_s0 }
  0x17   :  { %p707_p10 = pnand %p705_p9, %p702_p8 }
  0x19   :  { %710 = shalt.err (!%p707_p10)
}
  0x1a   :  { %s711_s18 = scalar_lea.vmem %s834_s16, 256  ;;  %p716_p12 = scmp.lt.s32.totalorder %s834_s16, %s834_s16 }
  0x1b   :  { %p712_p11 = scmp.ne.s32.totalorder %s834_s16, %s711_s18  ;;  %p717_p13 = scmp.lt.s32.totalorder %s711_s18, %s711_s18 }
  0x1d   :  { %p718_p0 = por %p717_p13, %p716_p12 }
  0x1f   :  { %p719_p1 = pnand %p718_p0, %p712_p11 }
  0x21   :  { %722 = shalt.err (!%p719_p1)
}
  0x22   :  { %30 = dma.hbm_to_vmem [thread:$0]  %s979_s0, 256, %s834_s16, [#allocation3], %s775_s25, %s775_s25, %s776_s26  }
  0x23   :  { %s777_s19 = smov [#allocation6]   ;;  %s778_s21 = smov [#allocation7]  }
  0x24   :  { %s50_s20 = sshll.u32 %s777_s19, 4  ;;  %s62_s22 = sshll.u32 %s778_s21, 4  ;;  %s51_s20 = int_to_ptr.vmem [resolvable:$true] %s50_s20  ;;  %s871_s22 = int_to_ptr.vmem [resolvable:$true] %s62_s22 }
  0x25   :  { %s723_s27 = scalar_lea.hbm %s982_s3, 512 }
  0x26   :  { %p724_p2 = scmp.ne.s32.totalorder %s982_s3, %s723_s27  ;;  %p727_p3 = scmp.lt.u32.totalorder %s723_s27, %s982_s3 }
  0x28   :  { %p729_p4 = pnand %p727_p3, %p724_p2 }
  0x2a   :  { %732 = shalt.err (!%p729_p4)
}
  0x2b   :  { %s733_s0 = scalar_lea.vmem %s51_s20, 512  ;;  %p738_p6 = scmp.lt.s32.totalorder %s51_s20, %s51_s20 }
  0x2c   :  { %p734_p5 = scmp.ne.s32.totalorder %s51_s20, %s733_s0  ;;  %p739_p7 = scmp.lt.s32.totalorder %s733_s0, %s733_s0 }
  0x2e   :  { %p740_p8 = por %p739_p7, %p738_p6 }
  0x30   :  { %p741_p9 = pnand %p740_p8, %p734_p5 }
  0x32   :  { %744 = shalt.err (!%p741_p9)
}
  0x33   :  { %56 = dma.hbm_to_vmem [thread:$0]  %s982_s3, 512, %s51_s20, [#allocation5], %s775_s25, %s775_s25, %s776_s26  }
  0x34   :  { %s745_s17 = scalar_lea.hbm %s983_s4, 512 }
  0x35   :  { %p746_p10 = scmp.ne.s32.totalorder %s983_s4, %s745_s17  ;;  %p749_p11 = scmp.lt.u32.totalorder %s745_s17, %s983_s4 }
  0x37   :  { %p751_p12 = pnand %p749_p11, %p746_p10 }
  0x39   :  { %754 = shalt.err (!%p751_p12)
}
  0x3a   :  { %s755_s21 = scalar_lea.vmem %s871_s22, 512  ;;  %p760_p0 = scmp.lt.s32.totalorder %s871_s22, %s871_s22 }
  0x3b   :  { %p756_p13 = scmp.ne.s32.totalorder %s871_s22, %s755_s21  ;;  %p761_p1 = scmp.lt.s32.totalorder %s755_s21, %s755_s21 }
  0x3d   :  { %p762_p2 = por %p761_p1, %p760_p0 }
  0x3f   :  { %p763_p3 = pnand %p762_p2, %p756_p13 }
  0x41   :  { %766 = shalt.err (!%p763_p3)
}
  0x42   :  { %68 = dma.hbm_to_vmem [thread:$0]  %s983_s4, 512, %s871_s22, [#allocation8], %s775_s25, %s775_s25, %s776_s26  }
  0x43   :  { %767 = dma.done.wait [#allocation3], 256  }
  0x44   :  { %768 = vsyncadd [#allocation3], 4294967040 }
  0x45   :  { %769 = dma.done.wait [#allocation5], 768  }
  0x46   :  { %770 = vsyncadd [#allocation5], 4294966528 }
  0x47   :  { %771 = dma.done.wait [#allocation8], 512  }
  0x48   :  { %772 = vsyncadd [#allocation8], 4294966784  ;;  %vm106_vm0 = vcmask 261120   ;;  %v87_v0 = vld [vmem:[%s981_s2] sm:$0xff]  ;;  %v88_v1 = vld [vmem:[%s981_s2 + $0x8] sm:$0xff] }
  0x49   :  { %v89_v2 = vld [vmem:[%s981_s2 + $0x10] sm:$0xff]  ;;  %v633_v3 = vpack.c.bf16 %v88_v1, %v87_v0  ;;  %v90_v4 = vld [vmem:[%s981_s2 + $0x18] sm:$0xff]  ;;  %v83_v5 = vld [vmem:[#allocation2] sm:$0xff] }
  0x4a   :  { %v91_v6 = vld [vmem:[#allocation6] sm:$0xff]  ;;  %v637_v7 = vpack.c.bf16 %v90_v4, %v89_v2  ;;  %586 = vmatprep.mubr.msk.f32.mxu0 %vm106_vm0, %v83_v5  ;;  %v92_v8 = vld [vmem:[#allocation6 + $0x8] sm:$0xff]  ;;  %597 = vmatprep.mubr.msk.f32.mxu1 %vm106_vm0, %v83_v5  ;;  %v93_v12 = vld [vmem:[#allocation6 + $0x10] sm:$0xff] }
  0x4b   :  { %v95_v9 = vld [vmem:[#allocation7] sm:$0xff]  ;;  %634 = vmatprep.subr.bf16.mxu0 %v633_v3  ;;  %v641_v10 = vpack.c.bf16 %v92_v8, %v91_v6  ;;  %v96_v11 = vld [vmem:[#allocation7 + $0x8] sm:$0xff]  ;;  %v94_v13 = vld [vmem:[#allocation6 + $0x18] sm:$0xff] }
  0x4c   :  { %636 = vmatpush3.bf16.msra.mxu0 %v633_v3  ;;  %v645_v14 = vpack.c.bf16 %v94_v13, %v93_v12  ;;  %v649_v15 = vpack.c.bf16 %v96_v11, %v95_v9  ;;  %v97_v16 = vld [vmem:[#allocation7 + $0x10] sm:$0xff]  ;;  %v98_v17 = vld [vmem:[#allocation7 + $0x18] sm:$0xff]  ;;  %v84_v18 = vld [vmem:[#allocation2 + $0x8] sm:$0xff] }
  0x4d   :  { %638 = vmatprep.subr.bf16.mxu0 %v637_v7  ;;  %642 = vmatprep.subr.bf16.mxu1 %v641_v10  ;;  %v653_v19 = vpack.c.bf16 %v98_v17, %v97_v16  ;;  %v85_v20 = vld [vmem:[#allocation4] sm:$0xff]  ;;  %v86_v21 = vld [vmem:[#allocation4 + $0x8] sm:$0xff]  ;;  %v535_v22 = vld [vmem:[%s984_s5] ss:$0 sm:$0xff] }
  0x4e   :  { %644 = vmatpush3.bf16.msra.mxu1 %v641_v10  ;;  %v538_v24 = vld [vmem:[%s984_s5 + $0x1] ss:$0 sm:$0xff]  ;;  %v541_v32 = vld [vmem:[%s984_s5 + $0x2] ss:$0 sm:$0xff] }
  0x4f   :  { %646 = vmatprep.subr.bf16.mxu1 %v645_v14 }
  0x50   :  { %640 = vmatpush3.bf16.msra.mxu0 %v637_v7 }
  0x51   :  { %650 = vmatprep.subr.bf16.mxu0 %v649_v15 }
  0x52   :  { %648 = vmatpush3.bf16.msra.mxu1 %v645_v14 }
  0x53   :  { %587 = vmatmul.mubr.msk.f32.vlgmr.msra.gmra.mrb[0].mxu0 %vm106_vm0, %v84_v18  ;;  %658 = vmatprep.subr.bf16.mxu1 %v641_v10 }
  0x54   :  { %652 = vmatpush3.bf16.msra.mxu0 %v649_v15  ;;  %608 = vmatprep.mubr.msk.f32.mxu0 %vm106_vm0, %v83_v5 }
  0x55   :  { %654 = vmatprep.subr.bf16.mxu0 %v653_v19  ;;  %598 = vmatmul.mubr.msk.f32.vlgmr.msra.gmra.mrb[0].mxu1 %vm106_vm0, %v84_v18 }
  0x56   :  { %660 = vmatpush3.bf16.msra.mxu1 %v641_v10  ;;  %619 = vmatprep.mubr.msk.f32.mxu1 %vm106_vm0, %v85_v20 }
  0x57   :  { %662 = vmatprep.subr.bf16.mxu1 %v645_v14 }
  0x58   :  { %656 = vmatpush3.bf16.msra.mxu0 %v653_v19 }
  0x59   :  { %666 = vmatprep.subr.bf16.mxu0 %v649_v15 }
  0x5a   :  { %664 = vmatpush3.bf16.msra.mxu1 %v645_v14 }
  0x5b   :  { %609 = vmatmul.mubr.msk.f32.vlgmr.msra.gmra.mrb[2].mxu0 %vm106_vm0, %v84_v18 }
  0x5c   :  { %668 = vmatpush3.bf16.msra.mxu0 %v649_v15  ;;  %630 = vmatprep.mubr.msk.f32.mxu0 %vm106_vm0, %v85_v20 }
  0x5d   :  { %670 = vmatprep.subr.bf16.mxu0 %v653_v19  ;;  %620 = vmatmul.mubr.msk.f32.vlgmr.msra.gmra.mrb[2].mxu1 %vm106_vm0, %v86_v21 }
  0x60   :  { %672 = vmatpush3.bf16.msra.mxu0 %v653_v19 }
  0x63   :  { %631 = vmatmul.mubr.msk.f32.vlgmr.msra.gmra.mrb[4].mxu0 %vm106_vm0, %v86_v21 }
 0x126   :  { %v588_v23 = vpop.f32.mrb[0].mxu0 }
 0x127   :  { %v185_v25 = vadd.f32 %v588_v23, %v535_v22  ;;  %v179_v26 = vpop.f32.mrb[1].mxu0 }
 0x128   :  { %v180_v27 = vadd.f32 %v535_v22, %v179_v26  ;;  %v599_v28 = vpop.f32.mrb[0].mxu1 }
 0x129   :  { %189 = vst.msk [vmem:[%s985_s6 + $0x8] sm:$0xff] %vm106_vm0, %v185_v25  ;;  %v266_v29 = vadd.f32 %v599_v28, %v538_v24  ;;  %v260_v30 = vpop.f32.mrb[1].mxu1 }
 0x12a   :  { %188 = vst.msk [vmem:[%s985_s6] sm:$0xff] %vm106_vm0, %v180_v27  ;;  %v261_v31 = vadd.f32 %v538_v24, %v260_v30 }
 0x12b   :  { %270 = vst.msk [vmem:[%s986_s7 + $0x8] sm:$0xff] %vm106_vm0, %v266_v29 }
 0x12c   :  { %269 = vst.msk [vmem:[%s986_s7] sm:$0xff] %vm106_vm0, %v261_v31 }
 0x12e   :  { %v610_v33 = vpop.f32.mrb[2].mxu0 }
 0x12f   :  { %v347_v34 = vadd.f32 %v610_v33, %v541_v32  ;;  %v341_v35 = vpop.f32.mrb[3].mxu0 }
 0x130   :  { %v342_v36 = vadd.f32 %v541_v32, %v341_v35  ;;  %v621_v37 = vpop.f32.mrb[2].mxu1 }
 0x131   :  { %351 = vst.msk [vmem:[%s987_s8 + $0x8] sm:$0xff] %vm106_vm0, %v347_v34  ;;  %v430_v38 = vadd.f32 %v621_v37, %v538_v24  ;;  %v424_v39 = vpop.f32.mrb[3].mxu1 }
 0x132   :  { %350 = vst.msk [vmem:[%s987_s8] sm:$0xff] %vm106_vm0, %v342_v36  ;;  %v425_v40 = vadd.f32 %v538_v24, %v424_v39 }
 0x133   :  { %434 = vst.msk [vmem:[%s988_s9 + $0x8] sm:$0xff] %vm106_vm0, %v430_v38 }
 0x134   :  { %433 = vst.msk [vmem:[%s988_s9] sm:$0xff] %vm106_vm0, %v425_v40 }
 0x136   :  { %v632_v41 = vpop.f32.mrb[4].mxu0 }
 0x137   :  { %v507_v42 = vadd.f32 %v632_v41, %v541_v32  ;;  %v501_v43 = vpop.f32.mrb[5].mxu0 }
 0x138   :  { %v502_v44 = vadd.f32 %v541_v32, %v501_v43 }
 0x139   :  { %511 = vst.msk [vmem:[%s989_s10 + $0x8] sm:$0xff] %vm106_vm0, %v507_v42 }
 0x13a   :  { %510 = vst.msk [vmem:[%s989_s10] sm:$0xff] %vm106_vm0, %v502_v44 }
 0x13b   :  { %532 = vsyncpa [#allocation3], 1 }
 0x13c   :  { %533 = vsyncpa [#allocation5], 1 }
 0x13d   :  { %534 = vsyncpa [#allocation8], 1 }

// kernel: decoder_layer_forward.7
= control target key start
LH: loop header
LB: loop body
LE: loop exit
PB: predicated region body
PF: predicated region fallthrough
CT: control target
= control target key end

     0   :  { %vm33_vm0 = vcmask 261120   ;;  %s431_s2 = inlined_call_operand.vmem [shape: f32[32,32], index: 2, kind: input, shape index: {}]   ;;  %s432_s0 = inlined_call_operand.vmem [shape: f32[16,32], index: 0, kind: input, shape index: {}]   ;;  %s433_s4 = inlined_call_operand.vmem [shape: f32[4,32], index: 4, kind: input, shape index: {}]   ;;  %s434_s1 = inlined_call_operand.vmem [shape: f32[16,32], index: 1, kind: input, shape index: {}]   ;;  %s435_s3 = inlined_call_operand.vmem [shape: f32[32,32], index: 3, kind: input, shape index: {}]   ;;  %s436_s5 = inlined_call_operand.vmem [shape: f32[16,32], index: 5, kind: output, shape index: {0}]   ;;  %s437_s6 = inlined_call_operand.vmem [shape: f32[16,32], index: 6, kind: output, shape index: {1}]  }
   0x1   :  { %v24_v0 = vld [vmem:[%s431_s2] sm:$0xff]  ;;  %v25_v1 = vld [vmem:[%s431_s2 + $0x8] sm:$0xff]  ;;  %v26_v2 = vld [vmem:[%s431_s2 + $0x10] sm:$0xff] }
   0x2   :  { %v304_v3 = vpack.c.bf16 %v25_v1, %v24_v0  ;;  %v27_v4 = vld [vmem:[%s431_s2 + $0x18] sm:$0xff]  ;;  %v22_v5 = vld [vmem:[%s432_s0] sm:$0xff]  ;;  %v23_v7 = vld [vmem:[%s432_s0 + $0x8] sm:$0xff] }
   0x3   :  { %v308_v6 = vpack.c.bf16 %v27_v4, %v26_v2  ;;  %290 = vmatprep.mubr.msk.f32.mxu0 %vm33_vm0, %v22_v5  ;;  %v262_v8 = vld [vmem:[%s433_s4] ss:$0 sm:$0xff]  ;;  %v116_v14 = vld [vmem:[%s434_s1 + $0x8] sm:$0xff]  ;;  %v164_v31 = vld [vmem:[%s435_s3 + $0x10] sm:$0xff] }
   0x4   :  { %305 = vmatprep.subr.bf16.mxu0 %v304_v3  ;;  %v115_v11 = vld [vmem:[%s434_s1] sm:$0xff]  ;;  %v163_v30 = vld [vmem:[%s435_s3 + $0x8] sm:$0xff]  ;;  %v165_v33 = vld [vmem:[%s435_s3 + $0x18] sm:$0xff] }
   0x5   :  { %307 = vmatpush3.bf16.msra.mxu0 %v304_v3  ;;  %v162_v29 = vld [vmem:[%s435_s3] sm:$0xff]  ;;  %v316_v34 = vpack.c.bf16 %v165_v33, %v164_v31 }
   0x6   :  { %309 = vmatprep.subr.bf16.mxu0 %v308_v6  ;;  %v312_v32 = vpack.c.bf16 %v163_v30, %v162_v29  ;;  %v265_v42 = vld [vmem:[%s433_s4 + $0x1] ss:$0 sm:$0xff]  ;;  %v266_v44 = vld [vmem:[%s433_s4 + $0x2] ss:$0 sm:$0xff]  ;;  %v267_v51 = vld [vmem:[%s433_s4 + $0x3] ss:$0 sm:$0xff] }
   0x8   :  { %313 = vmatprep.subr.bf16.mxu1 %v312_v32 }
   0x9   :  { %311 = vmatpush3.bf16.msra.mxu0 %v308_v6  ;;  %315 = vmatpush3.bf16.msra.mxu1 %v312_v32 }
   0xa   :  { %317 = vmatprep.subr.bf16.mxu1 %v316_v34 }
   0xc   :  { %291 = vmatmul.mubr.msk.f32.vlgmr.msra.gmra.mrb[0].mxu0 %vm33_vm0, %v23_v7 }
   0xd   :  { %319 = vmatpush3.bf16.msra.mxu1 %v316_v34 }
  0xdf   :  { %v292_v9 = vpop.f32.mrb[0].mxu0 }
  0xe0   :  { %v106_v10 = vpop.f32.mrb[1].mxu0  ;;  %v112_v12 = vadd.f32 %v292_v9, %v262_v8 }
  0xe1   :  { %v107_v13 = vadd.f32 %v262_v8, %v106_v10 }
  0xe2   :  { %v118_v17 = vadd.f32 %v116_v14, %v112_v12 }
  0xe3   :  { %v117_v15 = vadd.f32 %v115_v11, %v107_v13 }
  0xe4   :  { %v124_v18 = vsel %vm33_vm0, %v118_v17, 0.0 }
  0xe5   :  { %v121_v16 = vsel %vm33_vm0, %v117_v15, 0.0 }
  0xe6   :  { %122 = vadd.xlane.f32.xlu0 %v121_v16 }
  0xea   :  { %125 = vadd.xlane.f32.xlu0 %v124_v18 }
 0x173   :  { %v123_v19 = vpop.xlane.xlu0 %122 }
 0x174   :  { %v128_v20 = vmul.f32 0.03125, %v123_v19 }
 0x176   :  { %v130_v21 = vsub.f32 %v117_v15, %v128_v20 }
 0x177   :  { %v126_v22 = vpop.xlane.xlu0 %125 }
 0x178   :  { %v129_v23 = vmul.f32 0.03125, %v126_v22  ;;  %v132_v24 = vmul.f32 %v130_v21, %v130_v21 }
 0x17a   :  { %v131_v25 = vsub.f32 %v118_v17, %v129_v23  ;;  %v134_v26 = vsel %vm33_vm0, %v132_v24, 0.0 }
 0x17b   :  { %135 = vadd.xlane.f32.xlu1 %v134_v26 }
 0x17c   :  { %v133_v27 = vmul.f32 %v131_v25, %v131_v25 }
 0x17e   :  { %v137_v28 = vsel %vm33_vm0, %v133_v27, 0.0 }
 0x17f   :  { %138 = vadd.xlane.f32.xlu1 %v137_v28 }
 0x208   :  { %v136_v35 = vpop.xlane.xlu1 %135 }
 0x209   :  { %v140_v36 = vmul.f32 0.03125, %v136_v35 }
 0x20b   :  { %v142_v37 = vadd.f32 1e-05, %v140_v36 }
 0x20c   :  { %v139_v38 = vpop.xlane.xlu1 %138 }
 0x20d   :  { %320 = vrsqrt.f32 %v142_v37  ;;  %v141_v39 = vmul.f32 0.03125, %v139_v38 }
 0x20f   :  { %v143_v40 = vadd.f32 1e-05, %v141_v39 }
 0x211   :  { %322 = vrsqrt.f32 %v143_v40 }
 0x217   :  { %v321_v41 = vpop.eup %320 }
 0x218   :  { %v146_v43 = vmul.f32 %v321_v41, %v130_v21 }
 0x21a   :  { %v152_v45 = vmul.f32 %v265_v42, %v146_v43 }
 0x21b   :  { %v323_v46 = vpop.eup %322 }
 0x21c   :  { %v147_v47 = vmul.f32 %v323_v46, %v131_v25  ;;  %v158_v48 = vadd.f32 %v266_v44, %v152_v45 }
 0x21e   :  { %v153_v49 = vmul.f32 %v265_v42, %v147_v47  ;;  %160 = vst.msk [vmem:[%s436_s5] sm:$0xff] %vm33_vm0, %v158_v48  ;;  %301 = vmatprep.mubr.msk.f32.mxu1 %vm33_vm0, %v158_v48 }
 0x220   :  { %v159_v50 = vadd.f32 %v266_v44, %v153_v49 }
 0x222   :  { %161 = vst.msk [vmem:[%s436_s5 + $0x8] sm:$0xff] %vm33_vm0, %v159_v50  ;;  %302 = vmatmul.mubr.msk.f32.vlgmr.msra.gmra.mrb[0].mxu1 %vm33_vm0, %v159_v50 }
 0x2f5   :  { %v303_v52 = vpop.f32.mrb[0].mxu1 }
 0x2f6   :  { %v249_v53 = vadd.f32 %v303_v52, %v267_v51  ;;  %v243_v54 = vpop.f32.mrb[1].mxu1 }
 0x2f7   :  { %v244_v55 = vadd.f32 %v267_v51, %v243_v54 }
 0x2f8   :  { %253 = vst.msk [vmem:[%s437_s6 + $0x8] sm:$0xff] %vm33_vm0, %v249_v53 }
 0x2f9   :  { %252 = vst.msk [vmem:[%s437_s6] sm:$0xff] %vm33_vm0, %v244_v55 }

// kernel: decoder_layer_forward.9
= control target key start
LH: loop header
LB: loop body
LE: loop exit
PB: predicated region body
PF: predicated region fallthrough
CT: control target
= control target key end

     0   :  { %vm35_vm0 = vcmask 261120   ;;  %s662_s0 = inlined_call_operand.vmem [shape: f32[16,32], index: 0, kind: input, shape index: {}]   ;;  %s663_s1 = inlined_call_operand.vmem [shape: f32[16,32], index: 1, kind: input, shape index: {}]   ;;  %s664_s2 = inlined_call_operand.vmem [shape: f32[32,32], index: 2, kind: input, shape index: {}]   ;;  %s665_s3 = inlined_call_operand.vmem [shape: f32[32,32], index: 3, kind: input, shape index: {}]   ;;  %s666_s4 = inlined_call_operand.vmem [shape: f32[32,32], index: 4, kind: input, shape index: {}]   ;;  %s667_s5 = inlined_call_operand.vmem [shape: f32[7,32], index: 5, kind: input, shape index: {}]   ;;  %s668_s6 = inlined_call_operand.hbm [shape: f32[16,32], index: 6, kind: output, shape index: {}]  }
   0x1   :  { %v26_v0 = vld [vmem:[%s664_s2] sm:$0xff]  ;;  %v27_v1 = vld [vmem:[%s664_s2 + $0x8] sm:$0xff]  ;;  %v28_v2 = vld [vmem:[%s664_s2 + $0x10] sm:$0xff] }
   0x2   :  { %v468_v3 = vpack.c.bf16 %v27_v1, %v26_v0  ;;  %v29_v4 = vld [vmem:[%s664_s2 + $0x18] sm:$0xff]  ;;  %v24_v5 = vld [vmem:[%s662_s0] sm:$0xff] }
   0x3   :  { %v472_v6 = vpack.c.bf16 %v29_v4, %v28_v2  ;;  %443 = vmatprep.mubr.msk.f32.mxu0 %vm35_vm0, %v24_v5 }
   0x4   :  { %11 = vsyncpa [#allocation3], 0  ;;  %469 = vmatprep.subr.bf16.mxu0 %v468_v3  ;;  %v25_v7 = vld [vmem:[%s662_s0 + $0x8] sm:$0xff]  ;;  %v404_v8 = vld [vmem:[%s667_s5] ss:$0 sm:$0xff]  ;;  %s527_s13 = smov [#allocation2]  }
   0x5   :  { %471 = vmatpush3.bf16.msra.mxu0 %v468_v3  ;;  %v117_v11 = vld [vmem:[%s663_s1] sm:$0xff]  ;;  %v118_v14 = vld [vmem:[%s663_s1 + $0x8] sm:$0xff]  ;;  %v164_v31 = vld [vmem:[%s665_s3 + $0x10] sm:$0xff]  ;;  %s393_s0 = sshll.u32 %s527_s13, 4  ;;  %s394_s0 = int_to_ptr.vmem [resolvable:$true] %s393_s0 }
   0x6   :  { %473 = vmatprep.subr.bf16.mxu0 %v472_v6  ;;  %v162_v29 = vld [vmem:[%s665_s3] sm:$0xff]  ;;  %v163_v30 = vld [vmem:[%s665_s3 + $0x8] sm:$0xff]  ;;  %v165_v33 = vld [vmem:[%s665_s3 + $0x18] sm:$0xff]  ;;  %s503_s1 = scalar_lea.vmem %s394_s0, 256  ;;  %p508_p1 = scmp.lt.s32.totalorder %s394_s0, %s394_s0 }
   0x7   :  { %v476_v32 = vpack.c.bf16 %v163_v30, %v162_v29  ;;  %v480_v34 = vpack.c.bf16 %v165_v33, %v164_v31  ;;  %v254_v35 = vld [vmem:[%s666_s4] sm:$0xff]  ;;  %v255_v36 = vld [vmem:[%s666_s4 + $0x8] sm:$0xff]  ;;  %v256_v54 = vld [vmem:[%s666_s4 + $0x10] sm:$0xff]  ;;  %p504_p0 = scmp.ne.s32.totalorder %s394_s0, %s503_s1  ;;  %p509_p2 = scmp.lt.s32.totalorder %s503_s1, %s503_s1 }
   0x8   :  { %v484_v37 = vpack.c.bf16 %v255_v36, %v254_v35  ;;  %v407_v45 = vld [vmem:[%s667_s5 + $0x1] ss:$0 sm:$0xff]  ;;  %v408_v47 = vld [vmem:[%s667_s5 + $0x2] ss:$0 sm:$0xff]  ;;  %v257_v55 = vld [vmem:[%s666_s4 + $0x18] sm:$0xff] }
   0x9   :  { %475 = vmatpush3.bf16.msra.mxu0 %v472_v6  ;;  %477 = vmatprep.subr.bf16.mxu1 %v476_v32  ;;  %v488_v56 = vpack.c.bf16 %v257_v55, %v256_v54  ;;  %v409_v57 = vld [vmem:[%s667_s5 + $0x3] ss:$0 sm:$0xff]  ;;  %v412_v0 = vld [vmem:[%s667_s5 + $0x4] ss:$0 sm:$0xff]  ;;  %v416_v30 = vld [vmem:[%s667_s5 + $0x6] ss:$0 sm:$0xff]  ;;  %p510_p3 = por %p509_p2, %p508_p1 }
   0xa   :  { %479 = vmatpush3.bf16.msra.mxu1 %v476_v32  ;;  %485 = vmatprep.subr.bf16.mxu0 %v484_v37 }
   0xb   :  { %481 = vmatprep.subr.bf16.mxu1 %v480_v34  ;;  %p511_p4 = pnand %p510_p3, %p504_p0 }
   0xc   :  { %444 = vmatmul.mubr.msk.f32.vlgmr.msra.gmra.mrb[0].mxu0 %vm35_vm0, %v25_v7 }
   0xd   :  { %487 = vmatpush3.bf16.msra.mxu0 %v484_v37 }
   0xe   :  { %483 = vmatpush3.bf16.msra.mxu1 %v480_v34  ;;  %489 = vmatprep.subr.bf16.mxu0 %v488_v56 }
  0x11   :  { %491 = vmatpush3.bf16.msra.mxu0 %v488_v56 }
  0xdf   :  { %v445_v9 = vpop.f32.mrb[0].mxu0 }
  0xe0   :  { %v108_v10 = vpop.f32.mrb[1].mxu0  ;;  %v114_v12 = vadd.f32 %v445_v9, %v404_v8 }
  0xe1   :  { %v109_v13 = vadd.f32 %v404_v8, %v108_v10 }
  0xe2   :  { %v120_v17 = vadd.f32 %v118_v14, %v114_v12 }
  0xe3   :  { %v119_v15 = vadd.f32 %v117_v11, %v109_v13 }
  0xe4   :  { %v126_v18 = vsel %vm35_vm0, %v120_v17, 0.0 }
  0xe5   :  { %v123_v16 = vsel %vm35_vm0, %v119_v15, 0.0 }
  0xe6   :  { %124 = vadd.xlane.f32.xlu0 %v123_v16 }
  0xea   :  { %127 = vadd.xlane.f32.xlu0 %v126_v18 }
 0x173   :  { %v125_v19 = vpop.xlane.xlu0 %124 }
 0x174   :  { %v130_v20 = vmul.f32 0.03125, %v125_v19 }
 0x176   :  { %v132_v21 = vsub.f32 %v119_v15, %v130_v20 }
 0x177   :  { %v128_v22 = vpop.xlane.xlu0 %127 }
 0x178   :  { %v131_v23 = vmul.f32 0.03125, %v128_v22  ;;  %v134_v24 = vmul.f32 %v132_v21, %v132_v21 }
 0x17a   :  { %v133_v25 = vsub.f32 %v120_v17, %v131_v23  ;;  %v136_v26 = vsel %vm35_vm0, %v134_v24, 0.0 }
 0x17b   :  { %137 = vadd.xlane.f32.xlu1 %v136_v26  ;;  %v415_v26 = vld [vmem:[%s667_s5 + $0x5] ss:$0 sm:$0xff] }
 0x17c   :  { %v135_v27 = vmul.f32 %v133_v25, %v133_v25 }
 0x17e   :  { %v139_v28 = vsel %vm35_vm0, %v135_v27, 0.0 }
 0x17f   :  { %140 = vadd.xlane.f32.xlu1 %v139_v28 }
 0x208   :  { %v138_v38 = vpop.xlane.xlu1 %137 }
 0x209   :  { %v142_v39 = vmul.f32 0.03125, %v138_v38 }
 0x20b   :  { %v144_v40 = vadd.f32 1e-05, %v142_v39 }
 0x20c   :  { %v141_v41 = vpop.xlane.xlu1 %140 }
 0x20d   :  { %495 = vrsqrt.f32 %v144_v40  ;;  %v143_v42 = vmul.f32 0.03125, %v141_v41 }
 0x20f   :  { %v145_v43 = vadd.f32 1e-05, %v143_v42 }
 0x211   :  { %497 = vrsqrt.f32 %v145_v43 }
 0x217   :  { %v496_v44 = vpop.eup %495 }
 0x218   :  { %v148_v46 = vmul.f32 %v496_v44, %v132_v21 }
 0x21a   :  { %v154_v48 = vmul.f32 %v407_v45, %v148_v46 }
 0x21b   :  { %v498_v49 = vpop.eup %497 }
 0x21c   :  { %v149_v50 = vmul.f32 %v498_v49, %v133_v25  ;;  %v160_v51 = vadd.f32 %v408_v47, %v154_v48 }
 0x21e   :  { %v155_v52 = vmul.f32 %v407_v45, %v149_v50  ;;  %454 = vmatprep.mubr.msk.f32.mxu1 %vm35_vm0, %v160_v51 }
 0x220   :  { %v161_v53 = vadd.f32 %v408_v47, %v155_v52 }
 0x222   :  { %455 = vmatmul.mubr.msk.f32.vlgmr.msra.gmra.mrb[0].mxu1 %vm35_vm0, %v161_v53 }
 0x2f5   :  { %v456_v58 = vpop.f32.mrb[0].mxu1 }
 0x2f6   :  { %v249_v59 = vadd.f32 %v456_v58, %v409_v57  ;;  %v243_v60 = vpop.f32.mrb[1].mxu1 }
 0x2f7   :  { %v244_v61 = vadd.f32 %v409_v57, %v243_v60 }
 0x2f8   :  { %v253_v63 = vmax.f32 %v249_v59, 0.0 }
 0x2f9   :  { %v252_v62 = vmax.f32 %v244_v61, 0.0 }
 0x2fb   :  { %465 = vmatprep.mubr.msk.f32.mxu0 %vm35_vm0, %v252_v62 }
 0x2fc   :  { %466 = vmatmul.mubr.msk.f32.vlgmr.msra.gmra.mrb[2].mxu0 %vm35_vm0, %v253_v63 }
 0x3cf   :  { %v467_v1 = vpop.f32.mrb[2].mxu0 }
 0x3d0   :  { %v341_v2 = vadd.f32 %v467_v1, %v412_v0  ;;  %v335_v3 = vpop.f32.mrb[3].mxu0 }
 0x3d1   :  { %v336_v4 = vadd.f32 %v412_v0, %v335_v3 }
 0x3d2   :  { %v345_v5 = vadd.f32 %v341_v2, %v161_v53 }
 0x3d3   :  { %v344_v6 = vadd.f32 %v336_v4, %v160_v51 }
 0x3d4   :  { %v351_v7 = vsel %vm35_vm0, %v345_v5, 0.0 }
 0x3d5   :  { %352 = vadd.xlane.f32.xlu1 %v351_v7  ;;  %v348_v8 = vsel %vm35_vm0, %v344_v6, 0.0 }
 0x3d6   :  { %349 = vadd.xlane.f32.xlu0 %v348_v8 }
 0x462   :  { %v353_v9 = vpop.xlane.xlu1 %352 }
 0x463   :  { %v355_v10 = vmul.f32 0.03125, %v353_v9  ;;  %v350_v11 = vpop.xlane.xlu0 %349 }
 0x464   :  { %v354_v12 = vmul.f32 0.03125, %v350_v11 }
 0x465   :  { %v357_v13 = vsub.f32 %v345_v5, %v355_v10 }
 0x466   :  { %v356_v14 = vsub.f32 %v344_v6, %v354_v12 }
 0x467   :  { %v359_v15 = vmul.f32 %v357_v13, %v357_v13 }
 0x468   :  { %v358_v16 = vmul.f32 %v356_v14, %v356_v14 }
 0x469   :  { %v363_v17 = vsel %vm35_vm0, %v359_v15, 0.0 }
 0x46a   :  { %364 = vadd.xlane.f32.xlu1 %v363_v17  ;;  %v360_v18 = vsel %vm35_vm0, %v358_v16, 0.0 }
 0x46b   :  { %361 = vadd.xlane.f32.xlu0 %v360_v18 }
 0x4f7   :  { %v365_v19 = vpop.xlane.xlu1 %364 }
 0x4f8   :  { %v367_v20 = vmul.f32 0.03125, %v365_v19  ;;  %v362_v21 = vpop.xlane.xlu0 %361 }
 0x4f9   :  { %v366_v22 = vmul.f32 0.03125, %v362_v21 }
 0x4fa   :  { %v369_v23 = vadd.f32 1e-05, %v367_v20 }
 0x4fb   :  { %v368_v24 = vadd.f32 1e-05, %v366_v22 }
 0x4fc   :  { %499 = vrsqrt.f32 %v369_v23 }
 0x4fd   :  { %501 = vrsqrt.f32 %v368_v24 }
 0x506   :  { %v500_v25 = vpop.eup %499 }
 0x507   :  { %v502_v27 = vpop.eup %501  ;;  %v373_v28 = vmul.f32 %v500_v25, %v357_v13 }
 0x508   :  { %v372_v29 = vmul.f32 %v502_v27, %v356_v14 }
 0x509   :  { %v379_v31 = vmul.f32 %v415_v26, %v373_v28 }
 0x50a   :  { %v378_v32 = vmul.f32 %v415_v26, %v372_v29 }
 0x50b   :  { %v385_v33 = vadd.f32 %v416_v30, %v379_v31 }
 0x50c   :  { %v384_v34 = vadd.f32 %v416_v30, %v378_v32 }
 0x50d   :  { %387 = vst.msk [vmem:[#allocation2 + $0x8] sm:$0xff] %vm35_vm0, %v385_v33 }
 0x50e   :  { %386 = vst.msk [vmem:[#allocation2] sm:$0xff] %vm35_vm0, %v384_v34 }
 0x50f   :  { %514 = shalt.err (!%p511_p4)
}
 0x510   :  { %s515_s15 = scalar_lea.hbm %s668_s6, 256 }
 0x511   :  { %p516_p5 = scmp.ne.s32.totalorder %s668_s6, %s515_s15  ;;  %p519_p6 = scmp.lt.u32.totalorder %s515_s15, %s668_s6 }
 0x513   :  { %p521_p7 = pnand %p519_p6, %p516_p5 }
 0x515   :  { %524 = shalt.err (!%p521_p7)
}
 0x516   :  { %s528_s20 = smov 128   ;;  %s529_s21 = smov 8  }
 0x517   :  { %399 = dma.vmem_to_hbm [thread:$0]  %s394_s0, 256, %s668_s6, [#allocation3], %s528_s20, %s528_s20, %s529_s21  }
 0x518   :  { %525 = dma.done.wait [#allocation3], 256  }
 0x519   :  { %526 = vsyncadd [#allocation3], 4294967040 }
 0x51a   :  { %403 = vsyncpa [#allocation3], 1 }

// kernel: decoder_layer_forward.6
= control target key start
LH: loop header
LB: loop body
LE: loop exit
PB: predicated region body
PF: predicated region fallthrough
CT: control target
= control target key end

     0   :  { %vm41_vm0 = vcmask 64512   ;;  %v1563_v2 = vmov 0.0   ;;  %vm1564_vm1 = vmmov 0   ;;  %s1817_s0 = inlined_call_operand.vmem [shape: f32[8,8,8], index: 0, kind: input, shape index: {}]   ;;  %s1818_s1 = inlined_call_operand.vmem [shape: f32[8,8,8], index: 1, kind: input, shape index: {}]   ;;  %s1819_s2 = inlined_call_operand.vmem [shape: f32[8,8,8], index: 2, kind: input, shape index: {}]   ;;  %s1820_s3 = inlined_call_operand.vmem [shape: f32[8,8,8], index: 3, kind: output, shape index: {0}]   ;;  %s1821_s4 = inlined_call_operand.hbm [shape: f32[8,8,8], index: 4, kind: output, shape index: {1}]  }
   0x1   :  { %v25_v0 = vld [vmem:[%s1818_s1] sm:$0xff]  ;;  %v26_v1 = vld [vmem:[%s1818_s1 + $0x8] sm:$0xff]  ;;  %1422 = vmatprep.subr.mxu0 %v1563_v2  ;;  %1424 = vmatprep.mubr.msk.f32.mxu0 %vm1564_vm1, %v1563_v2  ;;  %v27_v4 = vld [vmem:[%s1818_s1 + $0x10] sm:$0xff] }
   0x2   :  { %1423 = vmatpush3.xpose.msk.msra.mxu0 %vm41_vm0, %v25_v0  ;;  %v17_v3 = vld [vmem:[%s1817_s0] sm:$0xff]  ;;  %1427 = vmatprep.subr.mxu1 %v1563_v2  ;;  %v18_v5 = vld [vmem:[%s1817_s0 + $0x8] sm:$0xff]  ;;  %v28_v6 = vld [vmem:[%s1818_s1 + $0x18] sm:$0xff] }
   0x3   :  { %1432 = vmatprep.subr.mxu0 %v1563_v2  ;;  %1428 = vmatpush3.xpose.msk.msra.mxu1 %vm41_vm0, %v26_v1 }
   0x4   :  { %1429 = vmatprep.mubr.msk.f32.mxu1 %vm1564_vm1, %v1563_v2  ;;  %1437 = vmatprep.subr.mxu1 %v1563_v2 }
   0x5   :  { %1425 = vmatmul.mubr.msk.f32.vlgmr.msra.gmra.mrb[0].mxu0 %vm41_vm0, %v17_v3 }
   0x6   :  { %10 = vsyncpa [#allocation3], 0  ;;  %1433 = vmatpush3.xpose.msk.msra.mxu0 %vm41_vm0, %v27_v4  ;;  %1434 = vmatprep.mubr.msk.f32.mxu0 %vm1564_vm1, %v1563_v2  ;;  %v19_v7 = vld [vmem:[%s1817_s0 + $0x10] sm:$0xff]  ;;  %v29_v8 = vld [vmem:[%s1818_s1 + $0x20] sm:$0xff] }
   0x7   :  { %1430 = vmatmul.mubr.msk.f32.vlgmr.msra.gmra.mrb[0].mxu1 %vm41_vm0, %v18_v5  ;;  %1442 = vmatprep.subr.mxu0 %v1563_v2  ;;  %v20_v9 = vld [vmem:[%s1817_s0 + $0x18] sm:$0xff]  ;;  %v30_v10 = vld [vmem:[%s1818_s1 + $0x28] sm:$0xff]  ;;  %v21_v11 = vld [vmem:[%s1817_s0 + $0x20] sm:$0xff] }
   0x8   :  { %1438 = vmatpush3.xpose.msk.msra.mxu1 %vm41_vm0, %v28_v6  ;;  %1439 = vmatprep.mubr.msk.f32.mxu1 %vm1564_vm1, %v1563_v2  ;;  %v31_v12 = vld [vmem:[%s1818_s1 + $0x30] sm:$0xff]  ;;  %v22_v13 = vld [vmem:[%s1817_s0 + $0x28] sm:$0xff]  ;;  %v32_v14 = vld [vmem:[%s1818_s1 + $0x38] sm:$0xff] }
   0x9   :  { %1435 = vmatmul.mubr.msk.f32.vlgmr.msra.gmra.mrb[2].mxu0 %vm41_vm0, %v19_v7  ;;  %1447 = vmatprep.subr.mxu1 %v1563_v2  ;;  %v23_v15 = vld [vmem:[%s1817_s0 + $0x30] sm:$0xff]  ;;  %v24_v16 = vld [vmem:[%s1817_s0 + $0x38] sm:$0xff] }
   0xa   :  { %1443 = vmatpush3.xpose.msk.msra.mxu0 %vm41_vm0, %v29_v8  ;;  %1444 = vmatprep.mubr.msk.f32.mxu0 %vm1564_vm1, %v1563_v2 }
   0xb   :  { %1440 = vmatmul.mubr.msk.f32.vlgmr.msra.gmra.mrb[2].mxu1 %vm41_vm0, %v20_v9  ;;  %1452 = vmatprep.subr.mxu0 %v1563_v2 }
   0xc   :  { %1448 = vmatpush3.xpose.msk.msra.mxu1 %vm41_vm0, %v30_v10  ;;  %1449 = vmatprep.mubr.msk.f32.mxu1 %vm1564_vm1, %v1563_v2 }
   0xd   :  { %1445 = vmatmul.mubr.msk.f32.vlgmr.msra.gmra.mrb[4].mxu0 %vm41_vm0, %v21_v11  ;;  %1457 = vmatprep.subr.mxu1 %v1563_v2 }
   0xe   :  { %1453 = vmatpush3.xpose.msk.msra.mxu0 %vm41_vm0, %v31_v12  ;;  %1454 = vmatprep.mubr.msk.f32.mxu0 %vm1564_vm1, %v1563_v2 }
   0xf   :  { %1450 = vmatmul.mubr.msk.f32.vlgmr.msra.gmra.mrb[4].mxu1 %vm41_vm0, %v22_v13  ;;  %1462 = vmatprep.subr.mxu0 %v1563_v2 }
  0x10   :  { %1458 = vmatpush3.xpose.msk.msra.mxu1 %vm41_vm0, %v32_v14  ;;  %1459 = vmatprep.mubr.msk.f32.mxu1 %vm1564_vm1, %v1563_v2 }
  0x11   :  { %1455 = vmatmul.mubr.msk.f32.vlgmr.msra.gmra.mrb[6].mxu0 %vm41_vm0, %v23_v15  ;;  %1467 = vmatprep.subr.mxu1 %v1563_v2 }
  0x12   :  { %1464 = vmatprep.mubr.msk.f32.mxu0 %vm1564_vm1, %v1563_v2 }
  0x13   :  { %1460 = vmatmul.mubr.msk.f32.vlgmr.msra.gmra.mrb[6].mxu1 %vm41_vm0, %v24_v16 }
  0x14   :  { %1469 = vmatprep.mubr.msk.f32.mxu1 %vm1564_vm1, %v1563_v2 }
  0xd8   :  { %v114_v17 = vpop.f32.mrb[0].mxu0 }
  0xd9   :  { %v650_v18 = vmul.f32 0.70710677, %v114_v17  ;;  %v1426_v19 = vpop.f32.mrb[1].mxu0 }
  0xda   :  { %v190_v20 = vpop.f32.mrb[0].mxu1 }
  0xdb   :  { %v651_v21 = vmul.f32 0.70710677, %v190_v20  ;;  %v658_v22 = vsel %vm41_vm0, %v650_v18, -inf  ;;  %v1431_v23 = vpop.f32.mrb[1].mxu1 }
  0xdc   :  { %659 = vmax.xlane.f32.xlu0 %v658_v22  ;;  %v266_v24 = vpop.f32.mrb[2].mxu0 }
  0xdd   :  { %v652_v25 = vmul.f32 0.70710677, %v266_v24  ;;  %v1436_v26 = vpop.f32.mrb[3].mxu0  ;;  %v661_v27 = vsel %vm41_vm0, %v651_v21, -inf }
  0xde   :  { %v342_v28 = vpop.f32.mrb[2].mxu1  ;;  %v33_v26 = vld [vmem:[%s1819_s2] sm:$0xff] }
  0xdf   :  { %v653_v29 = vmul.f32 0.70710677, %v342_v28  ;;  %v664_v30 = vsel %vm41_vm0, %v652_v25, -inf  ;;  %v1441_v31 = vpop.f32.mrb[3].mxu1  ;;  %1463 = vmatpush3.msra.mxu0 %v33_v26 }
  0xe0   :  { %662 = vmax.xlane.f32.xlu0 %v661_v27  ;;  %665 = vmax.xlane.f32.xlu1 %v664_v30  ;;  %v418_v32 = vpop.f32.mrb[4].mxu0  ;;  %v34_v27 = vld [vmem:[%s1819_s2 + $0x8] sm:$0xff] }
  0xe1   :  { %v654_v33 = vmul.f32 0.70710677, %v418_v32  ;;  %v1446_v34 = vpop.f32.mrb[5].mxu0  ;;  %v667_v35 = vsel %vm41_vm0, %v653_v29, -inf  ;;  %1472 = vmatprep.subr.mxu0 %v1563_v2  ;;  %1468 = vmatpush3.msra.mxu1 %v34_v27 }
  0xe2   :  { %v494_v36 = vpop.f32.mrb[4].mxu1  ;;  %1477 = vmatprep.subr.mxu1 %v1563_v2 }
  0xe3   :  { %v655_v37 = vmul.f32 0.70710677, %v494_v36  ;;  %v670_v38 = vsel %vm41_vm0, %v654_v33, -inf  ;;  %v1451_v39 = vpop.f32.mrb[5].mxu1  ;;  %v35_v36 = vld [vmem:[%s1819_s2 + $0x10] sm:$0xff] }
  0xe4   :  { %668 = vmax.xlane.f32.xlu1 %v667_v35  ;;  %671 = vmax.xlane.f32.xlu0 %v670_v38  ;;  %v570_v40 = vpop.f32.mrb[6].mxu0 }
  0xe5   :  { %v656_v41 = vmul.f32 0.70710677, %v570_v40  ;;  %v673_v42 = vsel %vm41_vm0, %v655_v37, -inf  ;;  %v1456_v43 = vpop.f32.mrb[7].mxu0 }
  0xe6   :  { %v646_v44 = vpop.f32.mrb[6].mxu1 }
  0xe7   :  { %v657_v45 = vmul.f32 0.70710677, %v646_v44  ;;  %v676_v46 = vsel %vm41_vm0, %v656_v41, -inf  ;;  %v1461_v47 = vpop.f32.mrb[7].mxu1  ;;  %v37_v44 = vld [vmem:[%s1819_s2 + $0x20] sm:$0xff] }
  0xe8   :  { %674 = vmax.xlane.f32.xlu1 %v673_v42  ;;  %677 = vmax.xlane.f32.xlu0 %v676_v46  ;;  %v36_v42 = vld [vmem:[%s1819_s2 + $0x18] sm:$0xff] }
  0xe9   :  { %v679_v48 = vsel %vm41_vm0, %v657_v45, -inf }
  0xec   :  { %680 = vmax.xlane.f32.xlu1 %v679_v48  ;;  %v38_v48 = vld [vmem:[%s1819_s2 + $0x28] sm:$0xff] }
 0x169   :  { %v660_v49 = vpop.xlane.xlu0 %659 }
 0x16a   :  { %v682_v50 = vsub.f32 %v650_v18, %v660_v49 }
 0x16c   :  { %v690_v51 = vmul.f32 1.442695, %v682_v50  ;;  %v39_v50 = vld [vmem:[%s1819_s2 + $0x30] sm:$0xff] }
 0x16d   :  { %v663_v52 = vpop.xlane.xlu0 %662  ;;  %v666_v53 = vpop.xlane.xlu1 %665 }
 0x16e   :  { %1507 = vpow2.f32 %v690_v51  ;;  %v683_v54 = vsub.f32 %v651_v21, %v663_v52  ;;  %v684_v55 = vsub.f32 %v652_v25, %v666_v53 }
 0x170   :  { %v692_v56 = vmul.f32 1.442695, %v683_v54  ;;  %v694_v57 = vmul.f32 1.442695, %v684_v55  ;;  %v40_v54 = vld [vmem:[%s1819_s2 + $0x38] sm:$0xff]  ;;  %s1565_s2 = smov [#allocation2]  }
 0x171   :  { %v669_v58 = vpop.xlane.xlu1 %668  ;;  %v672_v59 = vpop.xlane.xlu0 %671  ;;  %s1353_s9 = sshll.u32 %s1565_s2, 4  ;;  %s1354_s9 = int_to_ptr.vmem [resolvable:$true] %s1353_s9 }
 0x172   :  { %1509 = vpow2.f32 %v692_v56  ;;  %v685_v60 = vsub.f32 %v653_v29, %v669_v58  ;;  %v686_v61 = vsub.f32 %v654_v33, %v672_v59  ;;  %s1539_s10 = scalar_lea.vmem %s1354_s9, 1024  ;;  %p1544_p1 = scmp.lt.s32.totalorder %s1354_s9, %s1354_s9 }
 0x173   :  { %1511 = vpow2.f32 %v694_v57  ;;  %p1540_p0 = scmp.ne.s32.totalorder %s1354_s9, %s1539_s10  ;;  %p1545_p2 = scmp.lt.s32.totalorder %s1539_s10, %s1539_s10 }
 0x174   :  { %v696_v62 = vmul.f32 1.442695, %v685_v60  ;;  %v698_v63 = vmul.f32 1.442695, %v686_v61 }
 0x175   :  { %v675_v0 = vpop.xlane.xlu1 %674  ;;  %v678_v1 = vpop.xlane.xlu0 %677  ;;  %p1546_p3 = por %p1545_p2, %p1544_p1 }
 0x176   :  { %1513 = vpow2.f32 %v696_v62  ;;  %v687_v3 = vsub.f32 %v655_v37, %v675_v0  ;;  %v688_v4 = vsub.f32 %v656_v41, %v678_v1 }
 0x177   :  { %1515 = vpow2.f32 %v698_v63  ;;  %p1547_p4 = pnand %p1546_p3, %p1540_p0 }
 0x178   :  { %v1508_v5 = vpop.eup %1507  ;;  %v700_v6 = vmul.f32 1.442695, %v687_v3  ;;  %v702_v7 = vmul.f32 1.442695, %v688_v4 }
 0x179   :  { %v681_v8 = vpop.xlane.xlu1 %680  ;;  %v706_v9 = vsel %vm41_vm0, %v1508_v5, 0.0 }
 0x17a   :  { %1517 = vpow2.f32 %v700_v6  ;;  %v689_v10 = vsub.f32 %v657_v45, %v681_v8  ;;  %707 = vadd.xlane.f32.xlu0 %v706_v9 }
 0x17b   :  { %1519 = vpow2.f32 %v702_v7 }
 0x17c   :  { %v1510_v11 = vpop.eup %1509  ;;  %v704_v12 = vmul.f32 1.442695, %v689_v10 }
 0x17d   :  { %v1512_v13 = vpop.eup %1511  ;;  %v709_v14 = vsel %vm41_vm0, %v1510_v11, 0.0 }
 0x17e   :  { %1521 = vpow2.f32 %v704_v12  ;;  %710 = vadd.xlane.f32.xlu1 %v709_v14  ;;  %v712_v15 = vsel %vm41_vm0, %v1512_v13, 0.0 }
 0x17f   :  { %713 = vadd.xlane.f32.xlu0 %v712_v15 }
 0x180   :  { %v1514_v16 = vpop.eup %1513 }
 0x181   :  { %v1516_v17 = vpop.eup %1515  ;;  %v715_v18 = vsel %vm41_vm0, %v1514_v16, 0.0 }
 0x182   :  { %716 = vadd.xlane.f32.xlu1 %v715_v18  ;;  %v718_v19 = vsel %vm41_vm0, %v1516_v17, 0.0 }
 0x183   :  { %719 = vadd.xlane.f32.xlu0 %v718_v19 }
 0x184   :  { %v1700_v20 = vpop.eup %1517 }
 0x185   :  { %v1702_v21 = vpop.eup %1519  ;;  %v721_v22 = vsel %vm41_vm0, %v1700_v20, 0.0 }
 0x186   :  { %722 = vadd.xlane.f32.xlu1 %v721_v22  ;;  %v724_v23 = vsel %vm41_vm0, %v1702_v21, 0.0 }
 0x187   :  { %725 = vadd.xlane.f32.xlu0 %v724_v23 }
 0x188   :  { %v1708_v24 = vpop.eup %1521 }
 0x189   :  { %v727_v25 = vsel %vm41_vm0, %v1708_v24, 0.0 }
 0x18a   :  { %728 = vadd.xlane.f32.xlu1 %v727_v25 }
 0x207   :  { %v708_v28 = vpop.xlane.xlu0 %707 }
 0x208   :  { %1523 = vrcp.f32 %v708_v28 }
 0x20b   :  { %v711_v29 = vpop.xlane.xlu1 %710 }
 0x20c   :  { %1525 = vrcp.f32 %v711_v29  ;;  %v714_v30 = vpop.xlane.xlu0 %713 }
 0x20d   :  { %1527 = vrcp.f32 %v714_v30 }
 0x20f   :  { %v717_v31 = vpop.xlane.xlu1 %716 }
 0x210   :  { %1529 = vrcp.f32 %v717_v31  ;;  %v720_v32 = vpop.xlane.xlu0 %719 }
 0x211   :  { %1531 = vrcp.f32 %v720_v32 }
 0x212   :  { %v1524_v33 = vpop.eup %1523 }
 0x213   :  { %v731_v34 = vmul.f32 %v1524_v33, %v1508_v5  ;;  %v723_v35 = vpop.xlane.xlu1 %722 }
 0x214   :  { %1533 = vrcp.f32 %v723_v35  ;;  %v726_v37 = vpop.xlane.xlu0 %725 }
 0x215   :  { %746 = vst.msk [vmem:[#allocation2] sm:$0xff] %vm41_vm0, %v731_v34  ;;  %1535 = vrcp.f32 %v726_v37  ;;  %1465 = vmatmul.mubr.msk.f32.vlgmr.msra.gmra.mrb[8].mxu0 %vm41_vm0, %v731_v34 }
 0x216   :  { %v1526_v38 = vpop.eup %1525  ;;  %1473 = vmatpush3.msra.mxu0 %v35_v36  ;;  %1474 = vmatprep.mubr.msk.f32.mxu0 %vm1564_vm1, %v1563_v2 }
 0x217   :  { %v1528_v39 = vpop.eup %1527  ;;  %v733_v40 = vmul.f32 %v1526_v38, %v1510_v11  ;;  %v729_v41 = vpop.xlane.xlu1 %728  ;;  %1482 = vmatprep.subr.mxu0 %v1563_v2 }
 0x218   :  { %v735_v43 = vmul.f32 %v1528_v39, %v1512_v13  ;;  %1537 = vrcp.f32 %v729_v41 }
 0x219   :  { %747 = vst.msk [vmem:[#allocation2 + $0x8] sm:$0xff] %vm41_vm0, %v733_v40  ;;  %1470 = vmatmul.mubr.msk.f32.vlgmr.msra.gmra.mrb[8].mxu1 %vm41_vm0, %v733_v40 }
 0x21a   :  { %v1530_v45 = vpop.eup %1529  ;;  %748 = vst.msk [vmem:[#allocation2 + $0x10] sm:$0xff] %vm41_vm0, %v735_v43  ;;  %1475 = vmatmul.mubr.msk.f32.vlgmr.msra.gmra.mrb[10].mxu0 %vm41_vm0, %v735_v43  ;;  %1478 = vmatpush3.msra.mxu1 %v36_v42 }
 0x21b   :  { %v1532_v46 = vpop.eup %1531  ;;  %v737_v47 = vmul.f32 %v1530_v45, %v1514_v16  ;;  %1479 = vmatprep.mubr.msk.f32.mxu1 %vm1564_vm1, %v1563_v2  ;;  %1483 = vmatpush3.msra.mxu0 %v37_v44 }
 0x21c   :  { %v739_v49 = vmul.f32 %v1532_v46, %v1516_v17  ;;  %1484 = vmatprep.mubr.msk.f32.mxu0 %vm1564_vm1, %v1563_v2  ;;  %1487 = vmatprep.subr.mxu1 %v1563_v2 }
 0x21d   :  { %749 = vst.msk [vmem:[#allocation2 + $0x18] sm:$0xff] %vm41_vm0, %v737_v47  ;;  %1480 = vmatmul.mubr.msk.f32.vlgmr.msra.gmra.mrb[10].mxu1 %vm41_vm0, %v737_v47  ;;  %1492 = vmatprep.subr.mxu0 %v1563_v2 }
 0x21e   :  { %v1534_v51 = vpop.eup %1533  ;;  %750 = vst.msk [vmem:[#allocation2 + $0x20] sm:$0xff] %vm41_vm0, %v739_v49  ;;  %1485 = vmatmul.mubr.msk.f32.vlgmr.msra.gmra.mrb[12].mxu0 %vm41_vm0, %v739_v49  ;;  %1488 = vmatpush3.msra.mxu1 %v38_v48 }
 0x21f   :  { %v1536_v52 = vpop.eup %1535  ;;  %v741_v53 = vmul.f32 %v1534_v51, %v1700_v20  ;;  %1489 = vmatprep.mubr.msk.f32.mxu1 %vm1564_vm1, %v1563_v2  ;;  %1493 = vmatpush3.msra.mxu0 %v39_v50 }
 0x220   :  { %v743_v55 = vmul.f32 %v1536_v52, %v1702_v21  ;;  %1494 = vmatprep.mubr.msk.f32.mxu0 %vm1564_vm1, %v1563_v2  ;;  %1497 = vmatprep.subr.mxu1 %v1563_v2 }
 0x221   :  { %751 = vst.msk [vmem:[#allocation2 + $0x28] sm:$0xff] %vm41_vm0, %v741_v53  ;;  %1490 = vmatmul.mubr.msk.f32.vlgmr.msra.gmra.mrb[12].mxu1 %vm41_vm0, %v741_v53 }
 0x222   :  { %v1538_v56 = vpop.eup %1537  ;;  %752 = vst.msk [vmem:[#allocation2 + $0x30] sm:$0xff] %vm41_vm0, %v743_v55  ;;  %1495 = vmatmul.mubr.msk.f32.vlgmr.msra.gmra.mrb[14].mxu0 %vm41_vm0, %v743_v55  ;;  %1498 = vmatpush3.msra.mxu1 %v40_v54 }
 0x223   :  { %v745_v57 = vmul.f32 %v1538_v56, %v1708_v24  ;;  %1499 = vmatprep.mubr.msk.f32.mxu1 %vm1564_vm1, %v1563_v2 }
 0x225   :  { %753 = vst.msk [vmem:[#allocation2 + $0x38] sm:$0xff] %vm41_vm0, %v745_v57  ;;  %1500 = vmatmul.mubr.msk.f32.vlgmr.msra.gmra.mrb[14].mxu1 %vm41_vm0, %v745_v57 }
 0x226   :  { %1550 = shalt.err (!%p1547_p4)
}
 0x227   :  { %s1551_s13 = scalar_lea.hbm %s1821_s4, 1024 }
 0x228   :  { %p1552_p5 = scmp.ne.s32.totalorder %s1821_s4, %s1551_s13  ;;  %p1555_p6 = scmp.lt.u32.totalorder %s1551_s13, %s1821_s4 }
 0x22a   :  { %p1557_p7 = pnand %p1555_p6, %p1552_p5 }
 0x22c   :  { %1560 = shalt.err (!%p1557_p7)
}
 0x22d   :  { %s1566_s18 = smov 128   ;;  %s1567_s19 = smov 8  }
 0x22e   :  { %1359 = dma.vmem_to_hbm [thread:$0]  %s1354_s9, 1024, %s1821_s4, [#allocation3], %s1566_s18, %s1566_s18, %s1567_s19  }
 0x2e8   :  { %v823_v2 = vpop.f32.mrb[8].mxu0 }
 0x2e9   :  { %1338 = vst.msk [vmem:[%s1820_s3] sm:$0xff] %vm41_vm0, %v823_v2  ;;  %v1466_v58 = vpop.f32.mrb[9].mxu0 }
 0x2ec   :  { %v896_v59 = vpop.f32.mrb[8].mxu1 }
 0x2ed   :  { %1339 = vst.msk [vmem:[%s1820_s3 + $0x8] sm:$0xff] %vm41_vm0, %v896_v59  ;;  %v969_v60 = vpop.f32.mrb[10].mxu0  ;;  %v1471_v61 = vpop.f32.mrb[9].mxu1 }
 0x2ee   :  { %1340 = vst.msk [vmem:[%s1820_s3 + $0x10] sm:$0xff] %vm41_vm0, %v969_v60  ;;  %v1476_v62 = vpop.f32.mrb[11].mxu0 }
 0x2f0   :  { %v1042_v63 = vpop.f32.mrb[10].mxu1 }
 0x2f1   :  { %1341 = vst.msk [vmem:[%s1820_s3 + $0x18] sm:$0xff] %vm41_vm0, %v1042_v63  ;;  %v1115_v0 = vpop.f32.mrb[12].mxu0  ;;  %v1481_v1 = vpop.f32.mrb[11].mxu1 }
 0x2f2   :  { %1342 = vst.msk [vmem:[%s1820_s3 + $0x20] sm:$0xff] %vm41_vm0, %v1115_v0  ;;  %v1486_v3 = vpop.f32.mrb[13].mxu0 }
 0x2f4   :  { %v1188_v4 = vpop.f32.mrb[12].mxu1 }
 0x2f5   :  { %1343 = vst.msk [vmem:[%s1820_s3 + $0x28] sm:$0xff] %vm41_vm0, %v1188_v4  ;;  %v1261_v5 = vpop.f32.mrb[14].mxu0  ;;  %v1491_v6 = vpop.f32.mrb[13].mxu1 }
 0x2f6   :  { %1344 = vst.msk [vmem:[%s1820_s3 + $0x30] sm:$0xff] %vm41_vm0, %v1261_v5  ;;  %v1496_v7 = vpop.f32.mrb[15].mxu0 }
 0x2f8   :  { %v1334_v8 = vpop.f32.mrb[14].mxu1 }
 0x2f9   :  { %1345 = vst.msk [vmem:[%s1820_s3 + $0x38] sm:$0xff] %vm41_vm0, %v1334_v8  ;;  %v1501_v9 = vpop.f32.mrb[15].mxu1 }
 0x2fa   :  { %1561 = dma.done.wait [#allocation3], 1024  }
 0x2fb   :  { %1562 = vsyncadd [#allocation3], 4294966272 }
 0x2fc   :  { %1365 = vsyncpa [#allocation3], 1 }

</bundles_post_ra>
